<compile_context>
chip_gen: v6e
topology: v6e:2x2x1
jax: 0.10.0
libtpu: 0.0.40
codegen_flags: <defaults>
</compile_context>

<pallas_src>
import functools

import jax
import jax.numpy as jnp
import numpy as np
from jax import lax
from jax.experimental import pallas as pl
from jax.experimental.pallas import tpu as pltpu


def _round_up(x, m):
    return (x + m - 1) // m * m


# ---------------------------------------------------------------------------
# In-kernel per-tile BN partials: masked (valid-row) per-channel sum and
# centered M2 (sum of squared deviations from the tile mean), all in f32.
# Zero-padded rows contribute 0 to the sum and are masked out of M2.
# ---------------------------------------------------------------------------
def _tile_stats(y, rows, tile_rows):
    i = pl.program_id(0)
    valid = rows - i * tile_rows                      # traced int32 scalar
    n = jnp.minimum(valid, tile_rows).astype(jnp.float32)
    s = jnp.sum(y, axis=0, keepdims=True)             # (1, Cpad)
    mean = s / n
    mask = (lax.broadcasted_iota(jnp.int32, y.shape, 0) < valid).astype(jnp.float32)
    d = y - mean
    m2 = jnp.sum(mask * (d * d), axis=0, keepdims=True)
    return s, m2


# ---------------------------------------------------------------------------
# Pass 1 (recompute path): conv matmul + per-tile stats, intermediate discarded.
# ---------------------------------------------------------------------------
def _conv_stats_kernel(p_ref, w_ref, sum_ref, m2_ref, *, rows, tile_rows):
    y = jnp.dot(p_ref[...], w_ref[...], preferred_element_type=jnp.float32)
    s, m2 = _tile_stats(y, rows, tile_rows)
    sum_ref[...] = s[None]
    m2_ref[...] = m2[None]


# ---------------------------------------------------------------------------
# Pass 1 (materialize path): conv matmul + per-tile stats, bf16 intermediate.
# Stats come from the f32 accumulator; only the stored copy is bf16.
# ---------------------------------------------------------------------------
def _conv_y_stats_kernel(p_ref, w_ref, y_ref, sum_ref, m2_ref, *, rows, tile_rows):
    y = jnp.dot(p_ref[...], w_ref[...], preferred_element_type=jnp.float32)
    s, m2 = _tile_stats(y, rows, tile_rows)
    y_ref[...] = y.astype(jnp.bfloat16)
    sum_ref[...] = s[None]
    m2_ref[...] = m2[None]


# ---------------------------------------------------------------------------
# Pass 2 (recompute path): redo the matmul, fused BN affine + ReLU epilogue.
# ---------------------------------------------------------------------------
def _conv_bn_relu_kernel(p_ref, w_ref, scale_ref, shift_ref, o_ref):
    y = jnp.dot(p_ref[...], w_ref[...], preferred_element_type=jnp.float32)
    o_ref[...] = jnp.maximum(y * scale_ref[...] + shift_ref[...], 0.0)


# ---------------------------------------------------------------------------
# Pass 2 (materialize path): read bf16 intermediate, BN affine + ReLU in f32.
# ---------------------------------------------------------------------------
def _bn_relu_kernel(y_ref, scale_ref, shift_ref, o_ref):
    y = y_ref[...].astype(jnp.float32)
    o_ref[...] = jnp.maximum(y * scale_ref[...] + shift_ref[...], 0.0)


# ---------------------------------------------------------------------------
# Generation-aware VMEM budget / tile selection.
# ---------------------------------------------------------------------------
def _vmem_budget_bytes():
    cap = 64 * 1024 * 1024          # conservative fallback (v7x physical)
    try:
        info = pltpu.get_tpu_info()
        for attr in ("vmem_capacity_bytes", "vmem_size_bytes", "vmem_bytes"):
            val = getattr(info, attr, None)
            if val:
                cap = int(val)
                break
    except Exception:
        pass
    # Leave headroom for compiler scratch / semaphores:
    #   v5e/v6e (128 MiB physical) -> ~80 MiB budget, v7x (64 MiB/TC) -> ~40 MiB.
    return max(32 * 1024 * 1024, min(cap * 5 // 8, 96 * 1024 * 1024))


def _pick_tile_rows(rows, Kdim, Cpad, budget):
    weight_bytes = Kdim * Cpad * 2
    # Conservative per-row working set covering the fattest pass of either path:
    # double-buffered bf16 patches in + bf16 y tile + f32 output tile.
    per_row = 2 * (Kdim * 2) + 2 * (Cpad * 2) + 2 * (Cpad * 4)
    usable = max(budget - weight_bytes - (4 << 20), per_row * 256)
    tr = (usable // per_row) // 256 * 256
    tr = int(max(256, min(tr, 2048)))
    return min(tr, _round_up(rows, 256))


# ---------------------------------------------------------------------------
# Wrapper: layout glue + two pallas_call passes + tiny Chan-merge BN combine.
# ---------------------------------------------------------------------------
def conv_block_forward(x_nchw, weight_oihw, gamma, beta, *, stride=1,
                       padding=None, eps=1e-5, tile_rows=None):
    """ConvBlock forward.  x_nchw:(N,Cin,H,W), weight_oihw:(Cout,Cin,KH,KW)."""
    N, Cin, H, W = x_nchw.shape
    Cout, Cin_w, KH, KW = weight_oihw.shape
    assert Cin == Cin_w
    if padding is None:
        padding = KH // 2
    H_out = (H + 2 * padding - KH) // stride + 1
    W_out = (W + 2 * padding - KW) // stride + 1

    Kdim = KH * KW * Cin                       # folded im2col contraction depth
    Cpad = _round_up(max(Cout, 128), 128)      # lane-dense output channels
    rows = N * H_out * W_out

    vmem_limit = _vmem_budget_bytes()
    if tile_rows is None:
        tr = _pick_tile_rows(rows, Kdim, Cpad, vmem_limit)
    else:
        tr = max(16, _round_up(int(tile_rows), 16))
        tr = min(tr, _round_up(rows, 16))
    rows_pad = _round_up(rows, tr)
    num_tiles = rows_pad // tr

    # Recompute the matmul in pass 2 when re-reading the patches is cheaper than
    # writing + reading a bf16 intermediate (Kdim*2B vs Cpad*2B each way).
    recompute = (Kdim * 2) < (Cpad * 4)

    # ----- wrapper-side layout glue (bf16 cast, pad, im2col, lane pad) -----
    x_nhwc = jnp.transpose(x_nchw, (0, 2, 3, 1)).astype(jnp.bfloat16)
    xp = jnp.pad(x_nhwc, ((0, 0), (padding, padding), (padding, padding), (0, 0)))
    taps = []
    for kh in range(KH):
        for kw in range(KW):
            taps.append(xp[:, kh:kh + stride * H_out:stride,
                           kw:kw + stride * W_out:stride, :])
    patches = jnp.concatenate(taps, axis=-1).reshape(rows, Kdim)
    # Zero row-padding contributes 0 to the sums and is masked out of M2, and the
    # final division always uses the true `rows` count (not rows_pad).
    patches = jnp.pad(patches, ((0, rows_pad - rows), (0, 0)))

    # OIHW -> (KH*KW*Cin, Cout) matching the tap concat order, pad output lanes.
    w_flat = jnp.transpose(weight_oihw, (2, 3, 1, 0)).reshape(Kdim, Cout)
    w_pad = jnp.pad(w_flat, ((0, 0), (0, Cpad - Cout))).astype(jnp.bfloat16)

    compiler_params = pltpu.CompilerParams(
        dimension_semantics=("parallel",),
        vmem_limit_bytes=vmem_limit)

    patch_spec = pl.BlockSpec((tr, Kdim), lambda i: (i, 0))
    weight_spec = pl.BlockSpec((Kdim, Cpad), lambda i: (0, 0))
    stat_spec = pl.BlockSpec((1, 1, Cpad), lambda i: (i, 0, 0))
    stat_shape = jax.ShapeDtypeStruct((num_tiles, 1, Cpad), jnp.float32)
    act_spec = pl.BlockSpec((tr, Cpad), lambda i: (i, 0))
    vec_spec = pl.BlockSpec((1, Cpad), lambda i: (0, 0))

    patch_bytes = patches.size * 2
    weight_bytes = w_pad.size * 2
    stat_bytes = 2 * num_tiles * Cpad * 4
    matmul_flops = 2 * rows_pad * Kdim * Cpad

    # ------------------------- pass 1: conv + stats -------------------------
    if recompute:
        cost1 = pl.CostEstimate(
            flops=matmul_flops, transcendentals=0,
            bytes_accessed=patch_bytes + weight_bytes + stat_bytes)
        sum_t, m2_t = pl.pallas_call(
            functools.partial(_conv_stats_kernel, rows=rows, tile_rows=tr),
            out_shape=(stat_shape, stat_shape),
            grid=(num_tiles,),
            in_specs=[patch_spec, weight_spec],
            out_specs=(stat_spec, stat_spec),
            compiler_params=compiler_params,
            cost_estimate=cost1,
        )(patches, w_pad)
        y2d = None
    else:
        cost1 = pl.CostEstimate(
            flops=matmul_flops, transcendentals=0,
            bytes_accessed=(patch_bytes + weight_bytes
                            + rows_pad * Cpad * 2 + stat_bytes))
        y2d, sum_t, m2_t = pl.pallas_call(
            functools.partial(_conv_y_stats_kernel, rows=rows, tile_rows=tr),
            out_shape=(jax.ShapeDtypeStruct((rows_pad, Cpad), jnp.bfloat16),
                       stat_shape, stat_shape),
            grid=(num_tiles,),
            in_specs=[patch_spec, weight_spec],
            out_specs=(act_spec, stat_spec, stat_spec),
            compiler_params=compiler_params,
            cost_estimate=cost1,
        )(patches, w_pad)

    # --------- tiny cross-tile BN combine (Chan merge of centered M2) ---------
    sum_t = sum_t.reshape(num_tiles, Cpad)
    m2_t = m2_t.reshape(num_tiles, Cpad)
    n_t = jnp.clip(rows - jnp.arange(num_tiles) * tr, 1, tr).astype(jnp.float32)
    n_t = n_t[:, None]                                       # (num_tiles, 1)
    count = jnp.float32(rows)
    grand_mean = jnp.sum(sum_t, axis=0) / count              # (Cpad,)
    mean_t = sum_t / n_t
    m2_total = (jnp.sum(m2_t, axis=0)
                + jnp.sum(n_t * (mean_t - grand_mean[None, :]) ** 2, axis=0))
    var = jnp.maximum(m2_total / count, 0.0)                 # biased, BN-style
    inv = lax.rsqrt(var + eps)
    gamma_pad = jnp.pad(gamma.astype(jnp.float32), (0, Cpad - Cout))
    beta_pad = jnp.pad(beta.astype(jnp.float32), (0, Cpad - Cout))
    scale = (gamma_pad * inv).reshape(1, Cpad)
    shift = (beta_pad - grand_mean * gamma_pad * inv).reshape(1, Cpad)

    # -------------------- pass 2: fused BN affine + ReLU --------------------
    if recompute:
        cost2 = pl.CostEstimate(
            flops=matmul_flops + 3 * rows_pad * Cpad, transcendentals=0,
            bytes_accessed=(patch_bytes + weight_bytes + 2 * Cpad * 4
                            + rows_pad * Cpad * 4))
        out2d = pl.pallas_call(
            _conv_bn_relu_kernel,
            out_shape=jax.ShapeDtypeStruct((rows_pad, Cpad), jnp.float32),
            grid=(num_tiles,),
            in_specs=[patch_spec, weight_spec, vec_spec, vec_spec],
            out_specs=act_spec,
            compiler_params=compiler_params,
            cost_estimate=cost2,
        )(patches, w_pad, scale, shift)
    else:
        cost2 = pl.CostEstimate(
            flops=3 * rows_pad * Cpad, transcendentals=0,
            bytes_accessed=(rows_pad * Cpad * 2 + 2 * Cpad * 4
                            + rows_pad * Cpad * 4))
        out2d = pl.pallas_call(
            _bn_relu_kernel,
            out_shape=jax.ShapeDtypeStruct((rows_pad, Cpad), jnp.float32),
            grid=(num_tiles,),
            in_specs=[act_spec, vec_spec, vec_spec],
            out_specs=act_spec,
            compiler_params=compiler_params,
            cost_estimate=cost2,
        )(y2d, scale, shift)

    out = out2d[:rows, :Cout].reshape(N, H_out, W_out, Cout)
    return jnp.transpose(out, (0, 3, 1, 2))                  # back to NCHW


def _reference(x_nchw, weight_oihw, gamma, beta, *, stride=1, padding=None,
               eps=1e-5):
    """Plain-JAX reference (conv + training-mode BN + ReLU), NCHW.

    Inputs are rounded through bf16 (as the kernel feeds the MXU) so the check
    isolates kernel-pipeline error rather than bf16 input quantization.
    """
    KH = weight_oihw.shape[2]
    if padding is None:
        padding = KH // 2
    xb = x_nchw.astype(jnp.bfloat16).astype(jnp.float32)
    wb = weight_oihw.astype(jnp.bfloat16).astype(jnp.float32)
    y = lax.conv_general_dilated(
        xb, wb, window_strides=(stride, stride),
        padding=[(padding, padding), (padding, padding)],
        dimension_numbers=("NCHW", "OIHW", "NCHW"))
    mean = jnp.mean(y, axis=(0, 2, 3), keepdims=True)
    var = jnp.mean((y - mean) ** 2, axis=(0, 2, 3), keepdims=True)
    yn = (y - mean) * lax.rsqrt(var + eps)
    yn = yn * gamma.reshape(1, -1, 1, 1) + beta.reshape(1, -1, 1, 1)
    return jnp.maximum(yn, 0.0)


if __name__ == "__main__":
    def run_case(N, Cin, H, W, Cout, K, stride, tol):
        key = jax.random.PRNGKey(0)
        kx, kw, kg, kb = jax.random.split(key, 4)
        x = jax.random.normal(kx, (N, Cin, H, W), dtype=jnp.float32)
        weight = 0.1 * jax.random.normal(kw, (Cout, Cin, K, K), dtype=jnp.float32)
        gamma = 1.0 + 0.1 * jax.random.normal(kg, (Cout,), dtype=jnp.float32)
        beta = 0.1 * jax.random.normal(kb, (Cout,), dtype=jnp.float32)
        fwd = jax.jit(functools.partial(conv_block_forward, stride=stride))
        out = jax.block_until_ready(fwd(x, weight, gamma, beta))
        ref = _reference(x, weight, gamma, beta, stride=stride)
        np.testing.assert_allclose(np.asarray(out), np.asarray(ref),
                                   rtol=tol, atol=tol)

    # ConvBlock(4 -> 8, k=3, s=1): exercises the fused "recompute" path
    # (no materialized intermediate).
    run_case(2, 4, 16, 16, 8, 3, 1, tol=2e-3)
    # ConvBlock(32 -> 16, k=3, s=2): exercises the bf16 "materialize" path and the
    # masked last-tile statistics (looser tol for the bf16-rounded intermediate).
    run_case(2, 32, 16, 16, 16, 3, 2, tol=2e-2)
    print("KERNEL_OK")
</pallas_src>

<mosaic_0001>
module attributes {stable_mosaic.version = 11 : i64} {
  func.func @_conv_stats_kernel(%arg0: i32, %arg1: memref<512x36xbf16, #tpu.memory_space<vmem>>, %arg2: memref<36x128xbf16, #tpu.memory_space<vmem>>, %arg3: memref<1x1x128xf32, #tpu.memory_space<vmem>>, %arg4: memref<1x1x128xf32, #tpu.memory_space<vmem>>) attributes {dimension_semantics = [#tpu.dimension_semantics<parallel>], iteration_bounds = array<i64: 1>, scalar_prefetch = 0 : i64, scratch_operands = 0 : i64, tpu.core_type = #tpu.core_type<tc>, window_params = [{transform_indices = @transform_0, window_bounds = array<i64: 512, 36>}, {pipeline_mode = #tpu.pipeline_mode<synchronous>, transform_indices = @transform_1, window_bounds = array<i64: 36, 128>}, {transform_indices = @transform_2, window_bounds = array<i64: 1, 1, 128>}, {transform_indices = @transform_3, window_bounds = array<i64: 1, 1, 128>}]} {
    %c0 = arith.constant 0 : index
    %c0_0 = arith.constant 0 : index
    %0 = vector.load %arg1[%c0, %c0_0] : memref<512x36xbf16, #tpu.memory_space<vmem>>, vector<512x36xbf16>
    %c0_1 = arith.constant 0 : index
    %c0_2 = arith.constant 0 : index
    %1 = vector.load %arg2[%c0_1, %c0_2] : memref<36x128xbf16, #tpu.memory_space<vmem>>, vector<36x128xbf16>
    %cst = arith.constant dense<0.000000e+00> : vector<512x128xf32>
    %2 = tpu.matmul %0, %1, %cst {dimension_numbers = #tpu.dot_dimension_numbers<[1], [0], [0], [1], [0, 0, 1, 1], [], []>} : vector<512x36xbf16>, vector<36x128xbf16>, vector<512x128xf32> -> vector<512x128xf32>
    %c512_i32 = arith.constant 512 : i32
    %3 = arith.muli %arg0, %c512_i32 : i32
    %c512_i32_3 = arith.constant 512 : i32
    %4 = arith.subi %c512_i32_3, %3 : i32
    %c512_i32_4 = arith.constant 512 : i32
    %5 = arith.minsi %4, %c512_i32_4 : i32
    %6 = arith.sitofp %5 : i32 to f32
    %cst_5 = arith.constant dense<0.000000e+00> : vector<128xf32>
    %7 = vector.multi_reduction <add>, %2, %cst_5 [0] : vector<512x128xf32> to vector<128xf32>
    %8 = vector.shape_cast %7 : vector<128xf32> to vector<1x128xf32>
    %9 = vector.broadcast %6 : f32 to vector<1x128xf32>
    %10 = arith.divf %8, %9 : vector<1x128xf32>
    %11 = tpu.iota {dimensions = array<i32: 0>} : vector<512x128xi32>
    %12 = vector.broadcast %4 : i32 to vector<512x128xi32>
    %13 = arith.cmpi slt, %11, %12 : vector<512x128xi32>
    %14 = arith.extui %13 : vector<512x128xi1> to vector<512x128xi32>
    %15 = arith.sitofp %14 : vector<512x128xi32> to vector<512x128xf32>
    %16 = vector.broadcast %10 : vector<1x128xf32> to vector<512x128xf32>
    %17 = arith.subf %2, %16 : vector<512x128xf32>
    %18 = arith.mulf %17, %17 : vector<512x128xf32>
    %19 = arith.mulf %15, %18 : vector<512x128xf32>
    %cst_6 = arith.constant dense<0.000000e+00> : vector<128xf32>
    %20 = vector.multi_reduction <add>, %19, %cst_6 [0] : vector<512x128xf32> to vector<128xf32>
    %21 = vector.shape_cast %20 : vector<128xf32> to vector<1x128xf32>
    %22 = vector.shape_cast %8 : vector<1x128xf32> to vector<1x1x128xf32>
    %c0_7 = arith.constant 0 : index
    %c0_8 = arith.constant 0 : index
    %c0_9 = arith.constant 0 : index
    %23 = vector.load %arg3[%c0_7, %c0_8, %c0_9] : memref<1x1x128xf32, #tpu.memory_space<vmem>>, vector<1x1x128xf32>
    tpu.vector_store %arg3[%c0_7, %c0_8, %c0_9], %22 {strides = array<i32>} : memref<1x1x128xf32, #tpu.memory_space<vmem>>, vector<1x1x128xf32>,
    %24 = vector.shape_cast %21 : vector<1x128xf32> to vector<1x1x128xf32>
    %c0_10 = arith.constant 0 : index
    %c0_11 = arith.constant 0 : index
    %c0_12 = arith.constant 0 : index
    %25 = vector.load %arg4[%c0_10, %c0_11, %c0_12] : memref<1x1x128xf32, #tpu.memory_space<vmem>>, vector<1x1x128xf32>
    tpu.vector_store %arg4[%c0_10, %c0_11, %c0_12], %24 {strides = array<i32>} : memref<1x1x128xf32, #tpu.memory_space<vmem>>, vector<1x1x128xf32>,
    return
  }
  func.func @transform_0(%arg0: i32) -> (i32, i32) {
    %c0_i32 = arith.constant 0 : i32
    %c0_i32_0 = arith.constant 0 : i32
    return %arg0, %c0_i32 : i32, i32
  }
  func.func @transform_1(%arg0: i32) -> (i32, i32) {
    %c0_i32 = arith.constant 0 : i32
    %c0_i32_0 = arith.constant 0 : i32
    %c0_i32_1 = arith.constant 0 : i32
    return %c0_i32, %c0_i32_0 : i32, i32
  }
  func.func @transform_2(%arg0: i32) -> (i32, i32, i32) {
    %c0_i32 = arith.constant 0 : i32
    %c0_i32_0 = arith.constant 0 : i32
    %c0_i32_1 = arith.constant 0 : i32
    return %arg0, %c0_i32, %c0_i32_0 : i32, i32, i32
  }
  func.func @transform_3(%arg0: i32) -> (i32, i32, i32) {
    %c0_i32 = arith.constant 0 : i32
    %c0_i32_0 = arith.constant 0 : i32
    %c0_i32_1 = arith.constant 0 : i32
    return %arg0, %c0_i32, %c0_i32_0 : i32, i32, i32
  }
}

module attributes {stable_mosaic.version = 11 : i64} {
  func.func @_conv_bn_relu_kernel(%arg0: i32, %arg1: memref<512x36xbf16, #tpu.memory_space<vmem>>, %arg2: memref<36x128xbf16, #tpu.memory_space<vmem>>, %arg3: memref<1x128xf32, #tpu.memory_space<vmem>>, %arg4: memref<1x128xf32, #tpu.memory_space<vmem>>, %arg5: memref<512x128xf32, #tpu.memory_space<vmem>>) attributes {dimension_semantics = [#tpu.dimension_semantics<parallel>], iteration_bounds = array<i64: 1>, scalar_prefetch = 0 : i64, scratch_operands = 0 : i64, tpu.core_type = #tpu.core_type<tc>, window_params = [{transform_indices = @transform_0, window_bounds = array<i64: 512, 36>}, {pipeline_mode = #tpu.pipeline_mode<synchronous>, transform_indices = @transform_1, window_bounds = array<i64: 36, 128>}, {pipeline_mode = #tpu.pipeline_mode<synchronous>, transform_indices = @transform_2, window_bounds = array<i64: 1, 128>}, {pipeline_mode = #tpu.pipeline_mode<synchronous>, transform_indices = @transform_3, window_bounds = array<i64: 1, 128>}, {transform_indices = @transform_4, window_bounds = array<i64: 512, 128>}]} {
    %c0 = arith.constant 0 : index
    %c0_0 = arith.constant 0 : index
    %0 = vector.load %arg1[%c0, %c0_0] : memref<512x36xbf16, #tpu.memory_space<vmem>>, vector<512x36xbf16>
    %c0_1 = arith.constant 0 : index
    %c0_2 = arith.constant 0 : index
    %1 = vector.load %arg2[%c0_1, %c0_2] : memref<36x128xbf16, #tpu.memory_space<vmem>>, vector<36x128xbf16>
    %cst = arith.constant dense<0.000000e+00> : vector<512x128xf32>
    %2 = tpu.matmul %0, %1, %cst {dimension_numbers = #tpu.dot_dimension_numbers<[1], [0], [0], [1], [0, 0, 1, 1], [], []>} : vector<512x36xbf16>, vector<36x128xbf16>, vector<512x128xf32> -> vector<512x128xf32>
    %c0_3 = arith.constant 0 : index
    %c0_4 = arith.constant 0 : index
    %3 = vector.load %arg3[%c0_3, %c0_4] : memref<1x128xf32, #tpu.memory_space<vmem>>, vector<1x128xf32>
    %4 = vector.broadcast %3 : vector<1x128xf32> to vector<512x128xf32>
    %5 = arith.mulf %2, %4 : vector<512x128xf32>
    %c0_5 = arith.constant 0 : index
    %c0_6 = arith.constant 0 : index
    %6 = vector.load %arg4[%c0_5, %c0_6] : memref<1x128xf32, #tpu.memory_space<vmem>>, vector<1x128xf32>
    %7 = vector.broadcast %6 : vector<1x128xf32> to vector<512x128xf32>
    %8 = arith.addf %5, %7 : vector<512x128xf32>
    %cst_7 = arith.constant 0.000000e+00 : f32
    %9 = vector.broadcast %cst_7 : f32 to vector<512x128xf32>
    %10 = arith.maximumf %8, %9 : vector<512x128xf32>
    %c0_8 = arith.constant 0 : index
    %c0_9 = arith.constant 0 : index
    %11 = vector.load %arg5[%c0_8, %c0_9] : memref<512x128xf32, #tpu.memory_space<vmem>>, vector<512x128xf32>
    tpu.vector_store %arg5[%c0_8, %c0_9], %10 {strides = array<i32>} : memref<512x128xf32, #tpu.memory_space<vmem>>, vector<512x128xf32>,
    return
  }
  func.func @transform_0(%arg0: i32) -> (i32, i32) {
    %c0_i32 = arith.constant 0 : i32
    %c0_i32_0 = arith.constant 0 : i32
    return %arg0, %c0_i32 : i32, i32
  }
  func.func @transform_1(%arg0: i32) -> (i32, i32) {
    %c0_i32 = arith.constant 0 : i32
    %c0_i32_0 = arith.constant 0 : i32
    %c0_i32_1 = arith.constant 0 : i32
    return %c0_i32, %c0_i32_0 : i32, i32
  }
  func.func @transform_2(%arg0: i32) -> (i32, i32) {
    %c0_i32 = arith.constant 0 : i32
    %c0_i32_0 = arith.constant 0 : i32
    %c0_i32_1 = arith.constant 0 : i32
    return %c0_i32, %c0_i32_0 : i32, i32
  }
  func.func @transform_3(%arg0: i32) -> (i32, i32) {
    %c0_i32 = arith.constant 0 : i32
    %c0_i32_0 = arith.constant 0 : i32
    %c0_i32_1 = arith.constant 0 : i32
    return %c0_i32, %c0_i32_0 : i32, i32
  }
  func.func @transform_4(%arg0: i32) -> (i32, i32) {
    %c0_i32 = arith.constant 0 : i32
    %c0_i32_0 = arith.constant 0 : i32
    return %arg0, %c0_i32 : i32, i32
  }
}

</mosaic_0001>

<bundles_post_ra>
// kernel: conv_block_forward.3
= control target key start
LH: loop header
LB: loop body
LE: loop exit
PB: predicated region body
PF: predicated region fallthrough
CT: control target
= control target key end

     0   :  { %vm359_vm0 = vcmask 1041408   ;;  %vm262_vm1 = vcmask 293888   ;;  %s1635_s1 = inlined_call_operand.vmem [shape: bf16[36,128], index: 1, kind: input, shape index: {}]   ;;  %s1636_s0 = inlined_call_operand.vmem [shape: bf16[512,36], index: 0, kind: input, shape index: {}]   ;;  %s1637_s2 = inlined_call_operand.vmem [shape: f32[1,128], index: 2, kind: input, shape index: {}]   ;;  %s1638_s3 = inlined_call_operand.vmem [shape: f32[1,128], index: 3, kind: input, shape index: {}]   ;;  %s1639_s4 = inlined_call_operand.vmem [shape: f32[512,128], index: 4, kind: output, shape index: {}]  }
   0x1   :  { %v1108_v0 = vld [vmem:[%s1635_s1 + $0x10] ss:$0 sps:$4 sm:$0x33]   ;;  %v1109_v1 = vld [vmem:[%s1635_s1 + $0x8] sm:$0xff]   ;;  %v1110_v3 = vld [vmem:[%s1635_s1] sm:$0xff]  }
   0x2   :  { %1106 = vmatprep.subr.msk.bf16.mxu0 %vm359_vm0, %v1108_v0  ;;  %1107 = vmatprep.subr.msk.bf16.mxu1 %vm359_vm0, %v1108_v0  ;;  %v361_v2 = vsel %vm359_vm0, %v1108_v0, 0  ;;  %v1111_v4 = vld [vmem:[%s1636_s0] sm:$0xff]   ;;  %v1113_v6 = vld [vmem:[%s1636_s0 + $0x8] sm:$0xff]   ;;  %v1115_v8 = vld [vmem:[%s1636_s0 + $0x10] sm:$0xff]  }
   0x3   :  { %1031 = vmatpush3.bf16.msra.mxu0 %v361_v2  ;;  %1103 = vmatpush3.bf16.msra.mxu1 %v361_v2  ;;  %v1112_v5 = vld [vmem:[%s1636_s0 + $0x80] sm:$0xff]   ;;  %v1114_v7 = vld [vmem:[%s1636_s0 + $0x88] sm:$0xff]   ;;  %v1116_v9 = vld [vmem:[%s1636_s0 + $0x90] sm:$0xff]  }
   0x4   :  { %1032 = vmatprep.subr.bf16.mxu0 %v1109_v1  ;;  %1101 = vmatprep.subr.bf16.mxu1 %v1109_v1  ;;  %v1117_v10 = vld [vmem:[%s1636_s0 + $0x18] sm:$0xff]   ;;  %v1119_v12 = vld [vmem:[%s1636_s0 + $0x20] sm:$0xff]   ;;  %v1121_v14 = vld [vmem:[%s1636_s0 + $0x28] sm:$0xff]  }
   0x5   :  { %1036 = vmatprep.mubr.msk.bf16.mxu0 %vm262_vm1, %v1111_v4  ;;  %1068 = vmatprep.mubr.msk.bf16.mxu1 %vm262_vm1, %v1112_v5  ;;  %v1118_v11 = vld [vmem:[%s1636_s0 + $0x98] sm:$0xff]   ;;  %v1120_v13 = vld [vmem:[%s1636_s0 + $0xa0] sm:$0xff]   ;;  %v1122_v15 = vld [vmem:[%s1636_s0 + $0xa8] sm:$0xff]  }
   0x6   :  { %v1123_v16 = vld [vmem:[%s1636_s0 + $0x30] sm:$0xff]   ;;  %v1125_v18 = vld [vmem:[%s1636_s0 + $0x38] sm:$0xff]   ;;  %v1127_v20 = vld [vmem:[%s1636_s0 + $0x40] sm:$0xff]  }
   0x7   :  { %1033 = vmatpush3.bf16.msra.mxu0 %v1109_v1  ;;  %1104 = vmatpush3.bf16.msra.mxu1 %v1109_v1  ;;  %v1124_v17 = vld [vmem:[%s1636_s0 + $0xb0] sm:$0xff]   ;;  %v1126_v19 = vld [vmem:[%s1636_s0 + $0xb8] sm:$0xff]   ;;  %v1128_v21 = vld [vmem:[%s1636_s0 + $0xc0] sm:$0xff]  }
   0x8   :  { %1034 = vmatprep.subr.bf16.mxu0 %v1110_v3  ;;  %1102 = vmatprep.subr.bf16.mxu1 %v1110_v3  ;;  %v1129_v22 = vld [vmem:[%s1636_s0 + $0x48] sm:$0xff]   ;;  %v1131_v24 = vld [vmem:[%s1636_s0 + $0x50] sm:$0xff]   ;;  %v1133_v26 = vld [vmem:[%s1636_s0 + $0x58] sm:$0xff]  }
   0x9   :  { %v1130_v23 = vld [vmem:[%s1636_s0 + $0xc8] sm:$0xff]   ;;  %v1132_v25 = vld [vmem:[%s1636_s0 + $0xd0] sm:$0xff]   ;;  %v1134_v27 = vld [vmem:[%s1636_s0 + $0xd8] sm:$0xff]  }
   0xa   :  { %v1135_v28 = vld [vmem:[%s1636_s0 + $0x60] sm:$0xff]   ;;  %v1137_v30 = vld [vmem:[%s1636_s0 + $0x68] sm:$0xff]   ;;  %v1139_v32 = vld [vmem:[%s1636_s0 + $0x70] sm:$0xff]  }
   0xb   :  { %1035 = vmatpush3.bf16.msra.mxu0 %v1110_v3  ;;  %1105 = vmatpush3.bf16.msra.mxu1 %v1110_v3  ;;  %v1136_v29 = vld [vmem:[%s1636_s0 + $0xe0] sm:$0xff]   ;;  %v1138_v31 = vld [vmem:[%s1636_s0 + $0xe8] sm:$0xff]   ;;  %v1140_v33 = vld [vmem:[%s1636_s0 + $0xf0] sm:$0xff]  }
   0xc   :  { %v1141_v34 = vld [vmem:[%s1636_s0 + $0x78] sm:$0xff]   ;;  %v1308_v36 = vld [vmem:[%s1637_s2] ss:$0 sm:$0xff] }
   0xd   :  { %v1142_v35 = vld [vmem:[%s1636_s0 + $0xf8] sm:$0xff]   ;;  %v1313_v38 = vld [vmem:[%s1638_s3] ss:$0 sm:$0xff] }
   0xe   :  { %1037 = vmatmul.mubr.msk.bf16.vlgmr.msra.gmra.mxu0 %vm262_vm1, %v1113_v6  ;;  %1069 = vmatmul.mubr.msk.bf16.vlgmr.msra.gmra.mxu1 %vm262_vm1, %v1114_v7 }
   0xf   :  { %1040 = vmatprep.mubr.msk.bf16.mxu0 %vm262_vm1, %v1115_v8  ;;  %1072 = vmatprep.mubr.msk.bf16.mxu1 %vm262_vm1, %v1116_v9 }
  0x16   :  { %1041 = vmatmul.mubr.msk.bf16.gmra.mxu0 %vm262_vm1, %v1117_v10  ;;  %1073 = vmatmul.mubr.msk.bf16.gmra.mxu1 %vm262_vm1, %v1118_v11 }
  0x17   :  { %1044 = vmatprep.mubr.msk.bf16.mxu0 %vm262_vm1, %v1119_v12  ;;  %1076 = vmatprep.mubr.msk.bf16.mxu1 %vm262_vm1, %v1120_v13 }
  0x1e   :  { %1045 = vmatmul.mubr.msk.bf16.gmra.mxu0 %vm262_vm1, %v1121_v14  ;;  %1077 = vmatmul.mubr.msk.bf16.gmra.mxu1 %vm262_vm1, %v1122_v15 }
  0x1f   :  { %1048 = vmatprep.mubr.msk.bf16.mxu0 %vm262_vm1, %v1123_v16  ;;  %1080 = vmatprep.mubr.msk.bf16.mxu1 %vm262_vm1, %v1124_v17 }
  0x26   :  { %1049 = vmatmul.mubr.msk.bf16.gmra.mxu0 %vm262_vm1, %v1125_v18  ;;  %1081 = vmatmul.mubr.msk.bf16.gmra.mxu1 %vm262_vm1, %v1126_v19 }
  0x27   :  { %1052 = vmatprep.mubr.msk.bf16.mxu0 %vm262_vm1, %v1127_v20  ;;  %1084 = vmatprep.mubr.msk.bf16.mxu1 %vm262_vm1, %v1128_v21 }
  0x2e   :  { %1053 = vmatmul.mubr.msk.bf16.gmra.mxu0 %vm262_vm1, %v1129_v22  ;;  %1085 = vmatmul.mubr.msk.bf16.gmra.mxu1 %vm262_vm1, %v1130_v23 }
  0x2f   :  { %1056 = vmatprep.mubr.msk.bf16.mxu0 %vm262_vm1, %v1131_v24  ;;  %1088 = vmatprep.mubr.msk.bf16.mxu1 %vm262_vm1, %v1132_v25 }
  0x36   :  { %1057 = vmatmul.mubr.msk.bf16.gmra.mxu0 %vm262_vm1, %v1133_v26  ;;  %1089 = vmatmul.mubr.msk.bf16.gmra.mxu1 %vm262_vm1, %v1134_v27 }
  0x37   :  { %1060 = vmatprep.mubr.msk.bf16.mxu0 %vm262_vm1, %v1135_v28  ;;  %1092 = vmatprep.mubr.msk.bf16.mxu1 %vm262_vm1, %v1136_v29 }
  0x3e   :  { %1061 = vmatmul.mubr.msk.bf16.gmra.mxu0 %vm262_vm1, %v1137_v30  ;;  %1093 = vmatmul.mubr.msk.bf16.gmra.mxu1 %vm262_vm1, %v1138_v31 }
  0x3f   :  { %1064 = vmatprep.mubr.msk.bf16.mxu0 %vm262_vm1, %v1139_v32  ;;  %1096 = vmatprep.mubr.msk.bf16.mxu1 %vm262_vm1, %v1140_v33 }
  0x46   :  { %1065 = vmatmul.mubr.msk.bf16.gmra.mxu0 %vm262_vm1, %v1141_v34  ;;  %1097 = vmatmul.mubr.msk.bf16.gmra.mxu1 %vm262_vm1, %v1142_v35 }
  0xce   :  { %v1038_v37 = vpop.f32.mrf.mxu0  ;;  %v1070_v39 = vpop.f32.mrf.mxu1 }
  0xcf   :  { %v661_v40 = vmul.f32 %v1038_v37, %v1308_v36  ;;  %v693_v41 = vmul.f32 %v1070_v39, %v1308_v36 }
  0xd0   :  { %v397_v42 = vpop.f32.mrf.mxu0  ;;  %v525_v43 = vpop.f32.mrf.mxu1 }
  0xd1   :  { %v732_v44 = vadd.f32 %v1313_v38, %v661_v40  ;;  %v764_v45 = vadd.f32 %v1313_v38, %v693_v41  ;;  %v659_v46 = vmul.f32 %v1308_v36, %v397_v42  ;;  %v691_v47 = vmul.f32 %v1308_v36, %v525_v43 }
  0xd2   :  { %v1039_v48 = vpop.f32.mrf.mxu0  ;;  %v1071_v49 = vpop.f32.mrf.mxu1 }
  0xd3   :  { %v796_v50 = vmax.f32 %v732_v44, 0.0  ;;  %v828_v51 = vmax.f32 %v764_v45, 0.0  ;;  %v730_v52 = vadd.f32 %v1313_v38, %v659_v46  ;;  %v762_v53 = vadd.f32 %v1313_v38, %v691_v47 }
  0xd4   :  { %v662_v54 = vmul.f32 %v1039_v48, %v1308_v36  ;;  %v694_v55 = vmul.f32 %v1071_v49, %v1308_v36  ;;  %v400_v56 = vpop.f32.mrf.mxu0  ;;  %v528_v57 = vpop.f32.mrf.mxu1 }
  0xd5   :  { %860 = vst [vmem:[%s1639_s4 + $0x10] sm:$0xff] %v796_v50  ;;  %892 = vst [vmem:[%s1639_s4 + $0x110] sm:$0xff] %v828_v51  ;;  %v794_v58 = vmax.f32 %v730_v52, 0.0  ;;  %v826_v59 = vmax.f32 %v762_v53, 0.0  ;;  %v660_v60 = vmul.f32 %v1308_v36, %v400_v56  ;;  %v692_v61 = vmul.f32 %v1308_v36, %v528_v57 }
  0xd6   :  { %v733_v62 = vadd.f32 %v1313_v38, %v662_v54  ;;  %v765_v63 = vadd.f32 %v1313_v38, %v694_v55  ;;  %v1042_v0 = vpop.f32.mrf.mxu0  ;;  %v1074_v1 = vpop.f32.mrf.mxu1 }
  0xd7   :  { %858 = vst [vmem:[%s1639_s4] sm:$0xff] %v794_v58  ;;  %890 = vst [vmem:[%s1639_s4 + $0x100] sm:$0xff] %v826_v59  ;;  %v731_v2 = vadd.f32 %v1313_v38, %v660_v60  ;;  %v763_v3 = vadd.f32 %v1313_v38, %v692_v61  ;;  %v665_v4 = vmul.f32 %v1042_v0, %v1308_v36 }
  0xd8   :  { %v697_v5 = vmul.f32 %v1074_v1, %v1308_v36  ;;  %v797_v6 = vmax.f32 %v733_v62, 0.0  ;;  %v829_v7 = vmax.f32 %v765_v63, 0.0  ;;  %v413_v8 = vpop.f32.mrf.mxu0  ;;  %v541_v9 = vpop.f32.mrf.mxu1 }
  0xd9   :  { %v795_v10 = vmax.f32 %v731_v2, 0.0  ;;  %v827_v11 = vmax.f32 %v763_v3, 0.0  ;;  %v736_v12 = vadd.f32 %v1313_v38, %v665_v4  ;;  %v663_v14 = vmul.f32 %v1308_v36, %v413_v8 }
  0xda   :  { %v768_v13 = vadd.f32 %v1313_v38, %v697_v5  ;;  %861 = vst [vmem:[%s1639_s4 + $0x18] sm:$0xff] %v797_v6  ;;  %893 = vst [vmem:[%s1639_s4 + $0x118] sm:$0xff] %v829_v7  ;;  %v695_v15 = vmul.f32 %v1308_v36, %v541_v9  ;;  %v1043_v16 = vpop.f32.mrf.mxu0  ;;  %v1075_v17 = vpop.f32.mrf.mxu1 }
  0xdb   :  { %859 = vst [vmem:[%s1639_s4 + $0x8] sm:$0xff] %v795_v10  ;;  %891 = vst [vmem:[%s1639_s4 + $0x108] sm:$0xff] %v827_v11  ;;  %v800_v18 = vmax.f32 %v736_v12, 0.0  ;;  %v666_v20 = vmul.f32 %v1043_v16, %v1308_v36  ;;  %v698_v21 = vmul.f32 %v1075_v17, %v1308_v36  ;;  %v734_v22 = vadd.f32 %v1313_v38, %v663_v14 }
  0xdc   :  { %v832_v19 = vmax.f32 %v768_v13, 0.0  ;;  %v766_v23 = vadd.f32 %v1313_v38, %v695_v15  ;;  %v416_v24 = vpop.f32.mrf.mxu0  ;;  %v544_v25 = vpop.f32.mrf.mxu1 }
  0xdd   :  { %864 = vst [vmem:[%s1639_s4 + $0x30] sm:$0xff] %v800_v18  ;;  %v737_v26 = vadd.f32 %v1313_v38, %v666_v20  ;;  %v769_v27 = vadd.f32 %v1313_v38, %v698_v21  ;;  %v664_v28 = vmul.f32 %v1308_v36, %v416_v24  ;;  %v696_v29 = vmul.f32 %v1308_v36, %v544_v25 }
  0xde   :  { %896 = vst [vmem:[%s1639_s4 + $0x130] sm:$0xff] %v832_v19  ;;  %v798_v30 = vmax.f32 %v734_v22, 0.0  ;;  %v830_v31 = vmax.f32 %v766_v23, 0.0  ;;  %v1046_v32 = vpop.f32.mrf.mxu0  ;;  %v1078_v33 = vpop.f32.mrf.mxu1 }
  0xdf   :  { %v801_v34 = vmax.f32 %v737_v26, 0.0  ;;  %v833_v35 = vmax.f32 %v769_v27, 0.0  ;;  %v735_v37 = vadd.f32 %v1313_v38, %v664_v28  ;;  %v767_v39 = vadd.f32 %v1313_v38, %v696_v29 }
  0xe0   :  { %862 = vst [vmem:[%s1639_s4 + $0x20] sm:$0xff] %v798_v30  ;;  %894 = vst [vmem:[%s1639_s4 + $0x120] sm:$0xff] %v830_v31  ;;  %v669_v40 = vmul.f32 %v1046_v32, %v1308_v36  ;;  %v701_v41 = vmul.f32 %v1078_v33, %v1308_v36  ;;  %v429_v42 = vpop.f32.mrf.mxu0  ;;  %v557_v43 = vpop.f32.mrf.mxu1 }
  0xe1   :  { %865 = vst [vmem:[%s1639_s4 + $0x38] sm:$0xff] %v801_v34  ;;  %897 = vst [vmem:[%s1639_s4 + $0x138] sm:$0xff] %v833_v35  ;;  %v799_v44 = vmax.f32 %v735_v37, 0.0  ;;  %v831_v45 = vmax.f32 %v767_v39, 0.0  ;;  %v667_v46 = vmul.f32 %v1308_v36, %v429_v42  ;;  %v699_v47 = vmul.f32 %v1308_v36, %v557_v43 }
  0xe2   :  { %v740_v48 = vadd.f32 %v1313_v38, %v669_v40  ;;  %v772_v49 = vadd.f32 %v1313_v38, %v701_v41  ;;  %v1047_v50 = vpop.f32.mrf.mxu0  ;;  %v1079_v51 = vpop.f32.mrf.mxu1 }
  0xe3   :  { %863 = vst [vmem:[%s1639_s4 + $0x28] sm:$0xff] %v799_v44  ;;  %895 = vst [vmem:[%s1639_s4 + $0x128] sm:$0xff] %v831_v45  ;;  %v738_v52 = vadd.f32 %v1313_v38, %v667_v46  ;;  %v770_v53 = vadd.f32 %v1313_v38, %v699_v47  ;;  %v670_v54 = vmul.f32 %v1047_v50, %v1308_v36 }
  0xe4   :  { %v702_v55 = vmul.f32 %v1079_v51, %v1308_v36  ;;  %v804_v56 = vmax.f32 %v740_v48, 0.0  ;;  %v836_v57 = vmax.f32 %v772_v49, 0.0  ;;  %v432_v58 = vpop.f32.mrf.mxu0  ;;  %v560_v59 = vpop.f32.mrf.mxu1 }
  0xe5   :  { %v802_v60 = vmax.f32 %v738_v52, 0.0  ;;  %v834_v61 = vmax.f32 %v770_v53, 0.0  ;;  %v741_v62 = vadd.f32 %v1313_v38, %v670_v54  ;;  %v668_v0 = vmul.f32 %v1308_v36, %v432_v58 }
  0xe6   :  { %v773_v63 = vadd.f32 %v1313_v38, %v702_v55  ;;  %868 = vst [vmem:[%s1639_s4 + $0x50] sm:$0xff] %v804_v56  ;;  %900 = vst [vmem:[%s1639_s4 + $0x150] sm:$0xff] %v836_v57  ;;  %v700_v1 = vmul.f32 %v1308_v36, %v560_v59  ;;  %v1050_v2 = vpop.f32.mrf.mxu0  ;;  %v1082_v3 = vpop.f32.mrf.mxu1 }
  0xe7   :  { %866 = vst [vmem:[%s1639_s4 + $0x40] sm:$0xff] %v802_v60  ;;  %898 = vst [vmem:[%s1639_s4 + $0x140] sm:$0xff] %v834_v61  ;;  %v805_v4 = vmax.f32 %v741_v62, 0.0  ;;  %v673_v6 = vmul.f32 %v1050_v2, %v1308_v36  ;;  %v705_v7 = vmul.f32 %v1082_v3, %v1308_v36  ;;  %v739_v8 = vadd.f32 %v1313_v38, %v668_v0 }
  0xe8   :  { %v837_v5 = vmax.f32 %v773_v63, 0.0  ;;  %v771_v9 = vadd.f32 %v1313_v38, %v700_v1  ;;  %v445_v10 = vpop.f32.mrf.mxu0  ;;  %v573_v11 = vpop.f32.mrf.mxu1 }
  0xe9   :  { %869 = vst [vmem:[%s1639_s4 + $0x58] sm:$0xff] %v805_v4  ;;  %v744_v12 = vadd.f32 %v1313_v38, %v673_v6  ;;  %v776_v13 = vadd.f32 %v1313_v38, %v705_v7  ;;  %v671_v14 = vmul.f32 %v1308_v36, %v445_v10  ;;  %v703_v15 = vmul.f32 %v1308_v36, %v573_v11 }
  0xea   :  { %901 = vst [vmem:[%s1639_s4 + $0x158] sm:$0xff] %v837_v5  ;;  %v803_v16 = vmax.f32 %v739_v8, 0.0  ;;  %v835_v17 = vmax.f32 %v771_v9, 0.0  ;;  %v1051_v18 = vpop.f32.mrf.mxu0  ;;  %v1083_v19 = vpop.f32.mrf.mxu1 }
  0xeb   :  { %v808_v20 = vmax.f32 %v744_v12, 0.0  ;;  %v840_v21 = vmax.f32 %v776_v13, 0.0  ;;  %v742_v22 = vadd.f32 %v1313_v38, %v671_v14  ;;  %v774_v23 = vadd.f32 %v1313_v38, %v703_v15 }
  0xec   :  { %867 = vst [vmem:[%s1639_s4 + $0x48] sm:$0xff] %v803_v16  ;;  %899 = vst [vmem:[%s1639_s4 + $0x148] sm:$0xff] %v835_v17  ;;  %v674_v24 = vmul.f32 %v1051_v18, %v1308_v36  ;;  %v706_v25 = vmul.f32 %v1083_v19, %v1308_v36  ;;  %v448_v26 = vpop.f32.mrf.mxu0  ;;  %v576_v27 = vpop.f32.mrf.mxu1 }
  0xed   :  { %872 = vst [vmem:[%s1639_s4 + $0x70] sm:$0xff] %v808_v20  ;;  %904 = vst [vmem:[%s1639_s4 + $0x170] sm:$0xff] %v840_v21  ;;  %v806_v28 = vmax.f32 %v742_v22, 0.0  ;;  %v838_v29 = vmax.f32 %v774_v23, 0.0  ;;  %v672_v30 = vmul.f32 %v1308_v36, %v448_v26  ;;  %v704_v31 = vmul.f32 %v1308_v36, %v576_v27 }
  0xee   :  { %v745_v32 = vadd.f32 %v1313_v38, %v674_v24  ;;  %v777_v33 = vadd.f32 %v1313_v38, %v706_v25  ;;  %v1054_v34 = vpop.f32.mrf.mxu0  ;;  %v1086_v35 = vpop.f32.mrf.mxu1 }
  0xef   :  { %870 = vst [vmem:[%s1639_s4 + $0x60] sm:$0xff] %v806_v28  ;;  %902 = vst [vmem:[%s1639_s4 + $0x160] sm:$0xff] %v838_v29  ;;  %v743_v37 = vadd.f32 %v1313_v38, %v672_v30  ;;  %v775_v39 = vadd.f32 %v1313_v38, %v704_v31  ;;  %v677_v40 = vmul.f32 %v1054_v34, %v1308_v36 }
  0xf0   :  { %v709_v41 = vmul.f32 %v1086_v35, %v1308_v36  ;;  %v809_v42 = vmax.f32 %v745_v32, 0.0  ;;  %v841_v43 = vmax.f32 %v777_v33, 0.0  ;;  %v461_v44 = vpop.f32.mrf.mxu0  ;;  %v589_v45 = vpop.f32.mrf.mxu1 }
  0xf1   :  { %v807_v46 = vmax.f32 %v743_v37, 0.0  ;;  %v839_v47 = vmax.f32 %v775_v39, 0.0  ;;  %v748_v48 = vadd.f32 %v1313_v38, %v677_v40  ;;  %v675_v50 = vmul.f32 %v1308_v36, %v461_v44 }
  0xf2   :  { %v780_v49 = vadd.f32 %v1313_v38, %v709_v41  ;;  %873 = vst [vmem:[%s1639_s4 + $0x78] sm:$0xff] %v809_v42  ;;  %905 = vst [vmem:[%s1639_s4 + $0x178] sm:$0xff] %v841_v43  ;;  %v707_v51 = vmul.f32 %v1308_v36, %v589_v45  ;;  %v1055_v52 = vpop.f32.mrf.mxu0  ;;  %v1087_v53 = vpop.f32.mrf.mxu1 }
  0xf3   :  { %871 = vst [vmem:[%s1639_s4 + $0x68] sm:$0xff] %v807_v46  ;;  %903 = vst [vmem:[%s1639_s4 + $0x168] sm:$0xff] %v839_v47  ;;  %v812_v54 = vmax.f32 %v748_v48, 0.0  ;;  %v678_v56 = vmul.f32 %v1055_v52, %v1308_v36  ;;  %v710_v57 = vmul.f32 %v1087_v53, %v1308_v36  ;;  %v746_v58 = vadd.f32 %v1313_v38, %v675_v50 }
  0xf4   :  { %v844_v55 = vmax.f32 %v780_v49, 0.0  ;;  %v778_v59 = vadd.f32 %v1313_v38, %v707_v51  ;;  %v464_v60 = vpop.f32.mrf.mxu0  ;;  %v592_v61 = vpop.f32.mrf.mxu1 }
  0xf5   :  { %876 = vst [vmem:[%s1639_s4 + $0x90] sm:$0xff] %v812_v54  ;;  %v749_v62 = vadd.f32 %v1313_v38, %v678_v56  ;;  %v781_v63 = vadd.f32 %v1313_v38, %v710_v57  ;;  %v676_v0 = vmul.f32 %v1308_v36, %v464_v60  ;;  %v708_v1 = vmul.f32 %v1308_v36, %v592_v61 }
  0xf6   :  { %908 = vst [vmem:[%s1639_s4 + $0x190] sm:$0xff] %v844_v55  ;;  %v810_v2 = vmax.f32 %v746_v58, 0.0  ;;  %v842_v3 = vmax.f32 %v778_v59, 0.0  ;;  %v1058_v4 = vpop.f32.mrf.mxu0  ;;  %v1090_v5 = vpop.f32.mrf.mxu1 }
  0xf7   :  { %v813_v6 = vmax.f32 %v749_v62, 0.0  ;;  %v845_v7 = vmax.f32 %v781_v63, 0.0  ;;  %v747_v8 = vadd.f32 %v1313_v38, %v676_v0  ;;  %v779_v9 = vadd.f32 %v1313_v38, %v708_v1 }
  0xf8   :  { %874 = vst [vmem:[%s1639_s4 + $0x80] sm:$0xff] %v810_v2  ;;  %906 = vst [vmem:[%s1639_s4 + $0x180] sm:$0xff] %v842_v3  ;;  %v681_v10 = vmul.f32 %v1058_v4, %v1308_v36  ;;  %v713_v11 = vmul.f32 %v1090_v5, %v1308_v36  ;;  %v477_v12 = vpop.f32.mrf.mxu0  ;;  %v605_v13 = vpop.f32.mrf.mxu1 }
  0xf9   :  { %877 = vst [vmem:[%s1639_s4 + $0x98] sm:$0xff] %v813_v6  ;;  %909 = vst [vmem:[%s1639_s4 + $0x198] sm:$0xff] %v845_v7  ;;  %v811_v14 = vmax.f32 %v747_v8, 0.0  ;;  %v843_v15 = vmax.f32 %v779_v9, 0.0  ;;  %v679_v16 = vmul.f32 %v1308_v36, %v477_v12  ;;  %v711_v17 = vmul.f32 %v1308_v36, %v605_v13 }
  0xfa   :  { %v752_v18 = vadd.f32 %v1313_v38, %v681_v10  ;;  %v784_v19 = vadd.f32 %v1313_v38, %v713_v11  ;;  %v1059_v20 = vpop.f32.mrf.mxu0  ;;  %v1091_v21 = vpop.f32.mrf.mxu1 }
  0xfb   :  { %875 = vst [vmem:[%s1639_s4 + $0x88] sm:$0xff] %v811_v14  ;;  %907 = vst [vmem:[%s1639_s4 + $0x188] sm:$0xff] %v843_v15  ;;  %v750_v22 = vadd.f32 %v1313_v38, %v679_v16  ;;  %v782_v23 = vadd.f32 %v1313_v38, %v711_v17  ;;  %v682_v24 = vmul.f32 %v1059_v20, %v1308_v36 }
  0xfc   :  { %v714_v25 = vmul.f32 %v1091_v21, %v1308_v36  ;;  %v816_v26 = vmax.f32 %v752_v18, 0.0  ;;  %v848_v27 = vmax.f32 %v784_v19, 0.0  ;;  %v480_v28 = vpop.f32.mrf.mxu0  ;;  %v608_v29 = vpop.f32.mrf.mxu1 }
  0xfd   :  { %v814_v30 = vmax.f32 %v750_v22, 0.0  ;;  %v846_v31 = vmax.f32 %v782_v23, 0.0  ;;  %v753_v32 = vadd.f32 %v1313_v38, %v682_v24  ;;  %v680_v34 = vmul.f32 %v1308_v36, %v480_v28 }
  0xfe   :  { %v785_v33 = vadd.f32 %v1313_v38, %v714_v25  ;;  %880 = vst [vmem:[%s1639_s4 + $0xb0] sm:$0xff] %v816_v26  ;;  %912 = vst [vmem:[%s1639_s4 + $0x1b0] sm:$0xff] %v848_v27  ;;  %v712_v35 = vmul.f32 %v1308_v36, %v608_v29  ;;  %v1062_v37 = vpop.f32.mrf.mxu0  ;;  %v1094_v39 = vpop.f32.mrf.mxu1 }
  0xff   :  { %878 = vst [vmem:[%s1639_s4 + $0xa0] sm:$0xff] %v814_v30  ;;  %910 = vst [vmem:[%s1639_s4 + $0x1a0] sm:$0xff] %v846_v31  ;;  %v817_v40 = vmax.f32 %v753_v32, 0.0  ;;  %v685_v42 = vmul.f32 %v1062_v37, %v1308_v36  ;;  %v717_v43 = vmul.f32 %v1094_v39, %v1308_v36  ;;  %v751_v44 = vadd.f32 %v1313_v38, %v680_v34 }
 0x100   :  { %v849_v41 = vmax.f32 %v785_v33, 0.0  ;;  %v783_v45 = vadd.f32 %v1313_v38, %v712_v35  ;;  %v493_v46 = vpop.f32.mrf.mxu0  ;;  %v621_v47 = vpop.f32.mrf.mxu1 }
 0x101   :  { %881 = vst [vmem:[%s1639_s4 + $0xb8] sm:$0xff] %v817_v40  ;;  %v756_v48 = vadd.f32 %v1313_v38, %v685_v42  ;;  %v788_v49 = vadd.f32 %v1313_v38, %v717_v43  ;;  %v683_v50 = vmul.f32 %v1308_v36, %v493_v46  ;;  %v715_v51 = vmul.f32 %v1308_v36, %v621_v47 }
 0x102   :  { %913 = vst [vmem:[%s1639_s4 + $0x1b8] sm:$0xff] %v849_v41  ;;  %v815_v52 = vmax.f32 %v751_v44, 0.0  ;;  %v847_v53 = vmax.f32 %v783_v45, 0.0  ;;  %v1063_v54 = vpop.f32.mrf.mxu0  ;;  %v1095_v55 = vpop.f32.mrf.mxu1 }
 0x103   :  { %v820_v56 = vmax.f32 %v756_v48, 0.0  ;;  %v852_v57 = vmax.f32 %v788_v49, 0.0  ;;  %v754_v58 = vadd.f32 %v1313_v38, %v683_v50  ;;  %v786_v59 = vadd.f32 %v1313_v38, %v715_v51 }
 0x104   :  { %879 = vst [vmem:[%s1639_s4 + $0xa8] sm:$0xff] %v815_v52  ;;  %911 = vst [vmem:[%s1639_s4 + $0x1a8] sm:$0xff] %v847_v53  ;;  %v686_v60 = vmul.f32 %v1063_v54, %v1308_v36  ;;  %v718_v61 = vmul.f32 %v1095_v55, %v1308_v36  ;;  %v496_v62 = vpop.f32.mrf.mxu0  ;;  %v624_v63 = vpop.f32.mrf.mxu1 }
 0x105   :  { %884 = vst [vmem:[%s1639_s4 + $0xd0] sm:$0xff] %v820_v56  ;;  %916 = vst [vmem:[%s1639_s4 + $0x1d0] sm:$0xff] %v852_v57  ;;  %v818_v0 = vmax.f32 %v754_v58, 0.0  ;;  %v850_v1 = vmax.f32 %v786_v59, 0.0  ;;  %v684_v2 = vmul.f32 %v1308_v36, %v496_v62  ;;  %v716_v3 = vmul.f32 %v1308_v36, %v624_v63 }
 0x106   :  { %v757_v4 = vadd.f32 %v1313_v38, %v686_v60  ;;  %v789_v5 = vadd.f32 %v1313_v38, %v718_v61  ;;  %v1066_v6 = vpop.f32.mrf.mxu0  ;;  %v1098_v7 = vpop.f32.mrf.mxu1 }
 0x107   :  { %882 = vst [vmem:[%s1639_s4 + $0xc0] sm:$0xff] %v818_v0  ;;  %914 = vst [vmem:[%s1639_s4 + $0x1c0] sm:$0xff] %v850_v1  ;;  %v755_v8 = vadd.f32 %v1313_v38, %v684_v2  ;;  %v787_v9 = vadd.f32 %v1313_v38, %v716_v3  ;;  %v689_v10 = vmul.f32 %v1066_v6, %v1308_v36 }
 0x108   :  { %v721_v11 = vmul.f32 %v1098_v7, %v1308_v36  ;;  %v821_v12 = vmax.f32 %v757_v4, 0.0  ;;  %v853_v13 = vmax.f32 %v789_v5, 0.0  ;;  %v509_v14 = vpop.f32.mrf.mxu0  ;;  %v637_v15 = vpop.f32.mrf.mxu1 }
 0x109   :  { %v819_v16 = vmax.f32 %v755_v8, 0.0  ;;  %v851_v17 = vmax.f32 %v787_v9, 0.0  ;;  %v760_v18 = vadd.f32 %v1313_v38, %v689_v10  ;;  %v687_v20 = vmul.f32 %v1308_v36, %v509_v14 }
 0x10a   :  { %v792_v19 = vadd.f32 %v1313_v38, %v721_v11  ;;  %885 = vst [vmem:[%s1639_s4 + $0xd8] sm:$0xff] %v821_v12  ;;  %917 = vst [vmem:[%s1639_s4 + $0x1d8] sm:$0xff] %v853_v13  ;;  %v719_v21 = vmul.f32 %v1308_v36, %v637_v15  ;;  %v1067_v22 = vpop.f32.mrf.mxu0  ;;  %v1099_v23 = vpop.f32.mrf.mxu1 }
 0x10b   :  { %883 = vst [vmem:[%s1639_s4 + $0xc8] sm:$0xff] %v819_v16  ;;  %915 = vst [vmem:[%s1639_s4 + $0x1c8] sm:$0xff] %v851_v17  ;;  %v824_v24 = vmax.f32 %v760_v18, 0.0  ;;  %v690_v26 = vmul.f32 %v1067_v22, %v1308_v36  ;;  %v722_v27 = vmul.f32 %v1099_v23, %v1308_v36  ;;  %v758_v28 = vadd.f32 %v1313_v38, %v687_v20 }
 0x10c   :  { %v856_v25 = vmax.f32 %v792_v19, 0.0  ;;  %v790_v29 = vadd.f32 %v1313_v38, %v719_v21  ;;  %v512_v30 = vpop.f32.mrf.mxu0  ;;  %v640_v31 = vpop.f32.mrf.mxu1 }
 0x10d   :  { %888 = vst [vmem:[%s1639_s4 + $0xf0] sm:$0xff] %v824_v24  ;;  %v761_v32 = vadd.f32 %v1313_v38, %v690_v26  ;;  %v793_v33 = vadd.f32 %v1313_v38, %v722_v27  ;;  %v688_v34 = vmul.f32 %v1308_v36, %v512_v30  ;;  %v720_v35 = vmul.f32 %v1308_v36, %v640_v31 }
 0x10e   :  { %920 = vst [vmem:[%s1639_s4 + $0x1f0] sm:$0xff] %v856_v25  ;;  %v822_v37 = vmax.f32 %v758_v28, 0.0  ;;  %v854_v39 = vmax.f32 %v790_v29, 0.0 }
 0x10f   :  { %v825_v40 = vmax.f32 %v761_v32, 0.0  ;;  %v857_v41 = vmax.f32 %v793_v33, 0.0  ;;  %v759_v42 = vadd.f32 %v1313_v38, %v688_v34  ;;  %v791_v43 = vadd.f32 %v1313_v38, %v720_v35 }
 0x110   :  { %886 = vst [vmem:[%s1639_s4 + $0xe0] sm:$0xff] %v822_v37  ;;  %918 = vst [vmem:[%s1639_s4 + $0x1e0] sm:$0xff] %v854_v39 }
 0x111   :  { %889 = vst [vmem:[%s1639_s4 + $0xf8] sm:$0xff] %v825_v40  ;;  %921 = vst [vmem:[%s1639_s4 + $0x1f8] sm:$0xff] %v857_v41  ;;  %v823_v36 = vmax.f32 %v759_v42, 0.0  ;;  %v855_v44 = vmax.f32 %v791_v43, 0.0 }
 0x113   :  { %887 = vst [vmem:[%s1639_s4 + $0xe8] sm:$0xff] %v823_v36  ;;  %919 = vst [vmem:[%s1639_s4 + $0x1e8] sm:$0xff] %v855_v44 }

// kernel: conv_block_forward.2
= control target key start
LH: loop header
LB: loop body
LE: loop exit
PB: predicated region body
PF: predicated region fallthrough
CT: control target
= control target key end

     0   :  { %vm355_vm0 = vcmask 1041408   ;;  %vm258_vm1 = vcmask 293888   ;;  %s1954_s1 = inlined_call_operand.vmem [shape: bf16[36,128], index: 1, kind: input, shape index: {}]   ;;  %s1955_s0 = inlined_call_operand.vmem [shape: bf16[512,36], index: 0, kind: input, shape index: {}]   ;;  %s1956_s2 = inlined_call_operand.vmem [shape: f32[1,1,128], index: 2, kind: output, shape index: {0}]   ;;  %s1957_s3 = inlined_call_operand.vmem [shape: f32[1,1,128], index: 3, kind: output, shape index: {1}]  }
   0x1   :  { %v1434_v0 = vld [vmem:[%s1954_s1 + $0x10] ss:$0 sps:$4 sm:$0x33]   ;;  %v1435_v1 = vld [vmem:[%s1954_s1 + $0x8] sm:$0xff]   ;;  %v1437_v3 = vld [vmem:[%s1955_s0] sm:$0xff]  }
   0x2   :  { %1432 = vmatprep.subr.msk.bf16.mxu0 %vm355_vm0, %v1434_v0  ;;  %v357_v2 = vsel %vm355_vm0, %v1434_v0, 0  ;;  %1433 = vmatprep.subr.msk.bf16.mxu1 %vm355_vm0, %v1434_v0  ;;  %v1436_v4 = vld [vmem:[%s1954_s1] sm:$0xff]   ;;  %v1438_v5 = vld [vmem:[%s1955_s0 + $0x8] sm:$0xff]   ;;  %v1439_v6 = vld [vmem:[%s1955_s0 + $0x10] sm:$0xff]  }
   0x3   :  { %1357 = vmatpush3.bf16.msra.mxu0 %v357_v2  ;;  %1429 = vmatpush3.bf16.msra.mxu1 %v357_v2  ;;  %v1440_v7 = vld [vmem:[%s1955_s0 + $0x18] sm:$0xff]   ;;  %v1441_v8 = vld [vmem:[%s1955_s0 + $0x20] sm:$0xff]   ;;  %v1454_v10 = vld [vmem:[%s1955_s0 + $0x88] sm:$0xff]  }
   0x4   :  { %1358 = vmatprep.subr.bf16.mxu0 %v1435_v1  ;;  %1427 = vmatprep.subr.bf16.mxu1 %v1435_v1  ;;  %v1453_v9 = vld [vmem:[%s1955_s0 + $0x80] sm:$0xff]   ;;  %v1455_v11 = vld [vmem:[%s1955_s0 + $0x90] sm:$0xff]   ;;  %v1442_v12 = vld [vmem:[%s1955_s0 + $0x28] sm:$0xff]  }
   0x5   :  { %1362 = vmatprep.mubr.msk.bf16.mxu0 %vm258_vm1, %v1437_v3  ;;  %1394 = vmatprep.mubr.msk.bf16.mxu1 %vm258_vm1, %v1453_v9  ;;  %v1443_v13 = vld [vmem:[%s1955_s0 + $0x30] sm:$0xff]   ;;  %v1456_v14 = vld [vmem:[%s1955_s0 + $0x98] sm:$0xff]   ;;  %v1457_v15 = vld [vmem:[%s1955_s0 + $0xa0] sm:$0xff]  }
   0x6   :  { %v1444_v16 = vld [vmem:[%s1955_s0 + $0x38] sm:$0xff]   ;;  %v1458_v17 = vld [vmem:[%s1955_s0 + $0xa8] sm:$0xff]   ;;  %v1445_v18 = vld [vmem:[%s1955_s0 + $0x40] sm:$0xff]  }
   0x7   :  { %1359 = vmatpush3.bf16.msra.mxu0 %v1435_v1  ;;  %1430 = vmatpush3.bf16.msra.mxu1 %v1435_v1  ;;  %v1459_v19 = vld [vmem:[%s1955_s0 + $0xb0] sm:$0xff]   ;;  %v1446_v20 = vld [vmem:[%s1955_s0 + $0x48] sm:$0xff]   ;;  %v1460_v21 = vld [vmem:[%s1955_s0 + $0xb8] sm:$0xff]  }
   0x8   :  { %1360 = vmatprep.subr.bf16.mxu0 %v1436_v4  ;;  %1428 = vmatprep.subr.bf16.mxu1 %v1436_v4  ;;  %v1447_v22 = vld [vmem:[%s1955_s0 + $0x50] sm:$0xff]   ;;  %v1461_v23 = vld [vmem:[%s1955_s0 + $0xc0] sm:$0xff]   ;;  %v1448_v24 = vld [vmem:[%s1955_s0 + $0x58] sm:$0xff]  }
   0x9   :  { %v1462_v25 = vld [vmem:[%s1955_s0 + $0xc8] sm:$0xff]   ;;  %v1449_v26 = vld [vmem:[%s1955_s0 + $0x60] sm:$0xff]   ;;  %v1463_v27 = vld [vmem:[%s1955_s0 + $0xd0] sm:$0xff]  }
   0xa   :  { %v1450_v28 = vld [vmem:[%s1955_s0 + $0x68] sm:$0xff]   ;;  %v1464_v29 = vld [vmem:[%s1955_s0 + $0xd8] sm:$0xff]   ;;  %v1451_v30 = vld [vmem:[%s1955_s0 + $0x70] sm:$0xff]  }
   0xb   :  { %1361 = vmatpush3.bf16.msra.mxu0 %v1436_v4  ;;  %1431 = vmatpush3.bf16.msra.mxu1 %v1436_v4  ;;  %v1465_v31 = vld [vmem:[%s1955_s0 + $0xe0] sm:$0xff]   ;;  %v1452_v32 = vld [vmem:[%s1955_s0 + $0x78] sm:$0xff]   ;;  %v1466_v33 = vld [vmem:[%s1955_s0 + $0xe8] sm:$0xff]  }
   0xc   :  { %v1467_v34 = vld [vmem:[%s1955_s0 + $0xf0] sm:$0xff]   ;;  %v1468_v35 = vld [vmem:[%s1955_s0 + $0xf8] sm:$0xff]  }
   0xe   :  { %1363 = vmatmul.mubr.msk.bf16.vlgmr.msra.gmra.mxu0 %vm258_vm1, %v1438_v5  ;;  %1395 = vmatmul.mubr.msk.bf16.vlgmr.msra.gmra.mxu1 %vm258_vm1, %v1454_v10 }
   0xf   :  { %1366 = vmatprep.mubr.msk.bf16.mxu0 %vm258_vm1, %v1439_v6  ;;  %1398 = vmatprep.mubr.msk.bf16.mxu1 %vm258_vm1, %v1455_v11 }
  0x16   :  { %1367 = vmatmul.mubr.msk.bf16.gmra.mxu0 %vm258_vm1, %v1440_v7  ;;  %1399 = vmatmul.mubr.msk.bf16.gmra.mxu1 %vm258_vm1, %v1456_v14 }
  0x17   :  { %1370 = vmatprep.mubr.msk.bf16.mxu0 %vm258_vm1, %v1441_v8  ;;  %1402 = vmatprep.mubr.msk.bf16.mxu1 %vm258_vm1, %v1457_v15 }
  0x1e   :  { %1371 = vmatmul.mubr.msk.bf16.gmra.mxu0 %vm258_vm1, %v1442_v12  ;;  %1403 = vmatmul.mubr.msk.bf16.gmra.mxu1 %vm258_vm1, %v1458_v17 }
  0x1f   :  { %1374 = vmatprep.mubr.msk.bf16.mxu0 %vm258_vm1, %v1443_v13  ;;  %1406 = vmatprep.mubr.msk.bf16.mxu1 %vm258_vm1, %v1459_v19 }
  0x26   :  { %1375 = vmatmul.mubr.msk.bf16.gmra.mxu0 %vm258_vm1, %v1444_v16  ;;  %1407 = vmatmul.mubr.msk.bf16.gmra.mxu1 %vm258_vm1, %v1460_v21 }
  0x27   :  { %1378 = vmatprep.mubr.msk.bf16.mxu0 %vm258_vm1, %v1445_v18  ;;  %1410 = vmatprep.mubr.msk.bf16.mxu1 %vm258_vm1, %v1461_v23 }
  0x2e   :  { %1379 = vmatmul.mubr.msk.bf16.gmra.mxu0 %vm258_vm1, %v1446_v20  ;;  %1411 = vmatmul.mubr.msk.bf16.gmra.mxu1 %vm258_vm1, %v1462_v25 }
  0x2f   :  { %1382 = vmatprep.mubr.msk.bf16.mxu0 %vm258_vm1, %v1447_v22  ;;  %1414 = vmatprep.mubr.msk.bf16.mxu1 %vm258_vm1, %v1463_v27 }
  0x36   :  { %1383 = vmatmul.mubr.msk.bf16.gmra.mxu0 %vm258_vm1, %v1448_v24  ;;  %1415 = vmatmul.mubr.msk.bf16.gmra.mxu1 %vm258_vm1, %v1464_v29 }
  0x37   :  { %1386 = vmatprep.mubr.msk.bf16.mxu0 %vm258_vm1, %v1449_v26  ;;  %1418 = vmatprep.mubr.msk.bf16.mxu1 %vm258_vm1, %v1465_v31 }
  0x3e   :  { %1387 = vmatmul.mubr.msk.bf16.gmra.mxu0 %vm258_vm1, %v1450_v28  ;;  %1419 = vmatmul.mubr.msk.bf16.gmra.mxu1 %vm258_vm1, %v1466_v33 }
  0x3f   :  { %1390 = vmatprep.mubr.msk.bf16.mxu0 %vm258_vm1, %v1451_v30  ;;  %1422 = vmatprep.mubr.msk.bf16.mxu1 %vm258_vm1, %v1467_v34 }
  0x46   :  { %1391 = vmatmul.mubr.msk.bf16.gmra.mxu0 %vm258_vm1, %v1452_v32  ;;  %1423 = vmatmul.mubr.msk.bf16.gmra.mxu1 %vm258_vm1, %v1468_v35 }
  0xce   :  { %v1626_v36 = vpop.f32.mrf.mxu0  ;;  %v1638_v42 = vpop.f32.mrf.mxu1 }
  0xd0   :  { %v1628_v37 = vpop.f32.mrf.mxu0  ;;  %v1643_v45 = vpop.f32.mrf.mxu1 }
  0xd2   :  { %v1630_v38 = vpop.f32.mrf.mxu0  ;;  %v1648_v48 = vpop.f32.mrf.mxu1 }
  0xd4   :  { %v1632_v39 = vpop.f32.mrf.mxu0  ;;  %v1653_v51 = vpop.f32.mrf.mxu1 }
  0xd5   :  { %v653_v40 = vadd.f32 %v1632_v39, %v1628_v37 }
  0xd6   :  { %v1636_v41 = vpop.f32.mrf.mxu0  ;;  %v1661_v56 = vpop.f32.mrf.mxu1 }
  0xd7   :  { %v654_v43 = vadd.f32 %v1626_v36, %v653_v40 }
  0xd8   :  { %v1641_v44 = vpop.f32.mrf.mxu0  ;;  %v1669_v61 = vpop.f32.mrf.mxu1 }
  0xd9   :  { %v655_v46 = vadd.f32 %v1630_v38, %v654_v43 }
  0xda   :  { %v1646_v47 = vpop.f32.mrf.mxu0  ;;  %v1677_v2 = vpop.f32.mrf.mxu1 }
  0xdb   :  { %v656_v49 = vadd.f32 %v655_v46, %v1641_v44  ;;  %1971 = vst [vmem:[#allocation2_spill] sm:$0xff] %v1677_v2 }
  0xdc   :  { %v1651_v50 = vpop.f32.mrf.mxu0  ;;  %v1685_v7 = vpop.f32.mrf.mxu1 }
  0xdd   :  { %v657_v52 = vadd.f32 %v656_v49, %v1651_v50 }
  0xde   :  { %v1656_v53 = vpop.f32.mrf.mxu0  ;;  %v1693_v12 = vpop.f32.mrf.mxu1 }
  0xdf   :  { %v658_v54 = vadd.f32 %v1636_v41, %v657_v52 }
  0xe0   :  { %v1659_v55 = vpop.f32.mrf.mxu0  ;;  %v1701_v17 = vpop.f32.mrf.mxu1 }
  0xe1   :  { %v659_v57 = vadd.f32 %v1646_v47, %v658_v54 }
  0xe2   :  { %v1664_v58 = vpop.f32.mrf.mxu0  ;;  %v1709_v22 = vpop.f32.mrf.mxu1 }
  0xe3   :  { %v660_v59 = vadd.f32 %v659_v57, %v1659_v55  ;;  %1972 = vst [vmem:[#allocation3_spill] sm:$0xff] %v1709_v22 }
  0xe4   :  { %v1667_v60 = vpop.f32.mrf.mxu0  ;;  %v1717_v27 = vpop.f32.mrf.mxu1 }
  0xe5   :  { %v661_v62 = vadd.f32 %v660_v59, %v1667_v60  ;;  %1973 = vst [vmem:[#allocation4_spill] sm:$0xff] %v1717_v27 }
  0xe6   :  { %v1672_v63 = vpop.f32.mrf.mxu0  ;;  %v1725_v32 = vpop.f32.mrf.mxu1 }
  0xe7   :  { %v662_v0 = vadd.f32 %v1656_v53, %v661_v62 }
  0xe8   :  { %v1675_v1 = vpop.f32.mrf.mxu0  ;;  %v1733_v43 = vpop.f32.mrf.mxu1 }
  0xe9   :  { %v663_v3 = vadd.f32 %v1664_v58, %v662_v0 }
  0xea   :  { %v1680_v4 = vpop.f32.mrf.mxu0  ;;  %v1741_v57 = vpop.f32.mrf.mxu1 }
  0xeb   :  { %v664_v5 = vadd.f32 %v663_v3, %v1675_v1  ;;  %1974 = vst [vmem:[#allocation5_spill] sm:$0xff] %v1741_v57 }
  0xec   :  { %v1683_v6 = vpop.f32.mrf.mxu0 }
  0xed   :  { %v665_v8 = vadd.f32 %v664_v5, %v1683_v6  ;;  %v1749_v5 = vpop.f32.mrf.mxu1 }
  0xee   :  { %v1688_v9 = vpop.f32.mrf.mxu0  ;;  %1975 = vst [vmem:[#allocation6_spill] sm:$0xff] %v1749_v5 }
  0xef   :  { %v666_v10 = vadd.f32 %v1672_v63, %v665_v8 }
  0xf0   :  { %v1691_v11 = vpop.f32.mrf.mxu0 }
  0xf1   :  { %v667_v13 = vadd.f32 %v1680_v4, %v666_v10 }
  0xf2   :  { %v1696_v14 = vpop.f32.mrf.mxu0 }
  0xf3   :  { %v668_v15 = vadd.f32 %v667_v13, %v1691_v11  ;;  %v1753_v13 = vpop.f32.mrf.mxu1 }
  0xf4   :  { %v1699_v16 = vpop.f32.mrf.mxu0  ;;  %1976 = vst [vmem:[#allocation7_spill] sm:$0xff] %v1753_v13 }
  0xf5   :  { %v669_v18 = vadd.f32 %v668_v15, %v1699_v16 }
  0xf6   :  { %v1704_v19 = vpop.f32.mrf.mxu0 }
  0xf7   :  { %v670_v20 = vadd.f32 %v1688_v9, %v669_v18 }
  0xf8   :  { %v1707_v21 = vpop.f32.mrf.mxu0 }
  0xf9   :  { %v671_v23 = vadd.f32 %v1696_v14, %v670_v20  ;;  %v1757_v20 = vpop.f32.mrf.mxu1 }
  0xfa   :  { %v1712_v24 = vpop.f32.mrf.mxu0 }
  0xfb   :  { %v672_v25 = vadd.f32 %v671_v23, %v1707_v21 }
  0xfc   :  { %v1715_v26 = vpop.f32.mrf.mxu0 }
  0xfd   :  { %v673_v28 = vadd.f32 %v672_v25, %v1715_v26 }
  0xfe   :  { %v1720_v29 = vpop.f32.mrf.mxu0 }
  0xff   :  { %v674_v30 = vadd.f32 %v1704_v19, %v673_v28  ;;  %v1761_v28 = vpop.f32.mrf.mxu1 }
 0x100   :  { %v1723_v31 = vpop.f32.mrf.mxu0  ;;  %1977 = vst [vmem:[#allocation8_spill] sm:$0xff] %v1761_v28 }
 0x101   :  { %v675_v33 = vadd.f32 %v1712_v24, %v674_v30 }
 0x102   :  { %v1728_v34 = vpop.f32.mrf.mxu0 }
 0x103   :  { %v676_v35 = vadd.f32 %v675_v33, %v1723_v31 }
 0x104   :  { %v1731_v40 = vpop.f32.mrf.mxu0 }
 0x105   :  { %v677_v46 = vadd.f32 %v676_v35, %v1731_v40  ;;  %v1765_v35 = vpop.f32.mrf.mxu1 }
 0x106   :  { %v1736_v49 = vpop.f32.mrf.mxu0  ;;  %1978 = vst [vmem:[#allocation9_spill] sm:$0xff] %v1765_v35 }
 0x107   :  { %v678_v52 = vadd.f32 %v1720_v29, %v677_v46 }
 0x108   :  { %v1739_v54 = vpop.f32.mrf.mxu0 }
 0x109   :  { %v679_v59 = vadd.f32 %v1728_v34, %v678_v52 }
 0x10a   :  { %v1744_v62 = vpop.f32.mrf.mxu0 }
 0x10b   :  { %v680_v0 = vadd.f32 %v679_v59, %v1739_v54  ;;  %v1769_v59 = vpop.f32.mrf.mxu1 }
 0x10c   :  { %v1747_v3 = vpop.f32.mrf.mxu0  ;;  %1979 = vst [vmem:[#allocation10_spill] sm:$0xff] %v1769_v59 }
 0x10d   :  { %v681_v8 = vadd.f32 %v680_v0, %v1747_v3 }
 0x10f   :  { %v682_v10 = vadd.f32 %v1736_v49, %v681_v8 }
 0x111   :  { %v683_v15 = vadd.f32 %v1744_v62, %v682_v10  ;;  %v1773_v10 = vpop.f32.mrf.mxu1 }
 0x112   :  { %1980 = vst [vmem:[#allocation11_spill] sm:$0xff] %v1773_v10 }
 0x113   :  { %v684_v18 = vadd.f32 %v683_v15, %v1643_v45 }
 0x115   :  { %v685_v23 = vadd.f32 %v684_v18, %v1653_v51 }
 0x117   :  { %v686_v25 = vadd.f32 %v1638_v42, %v685_v23  ;;  %v1777_v23 = vpop.f32.mrf.mxu1 }
 0x118   :  { %1981 = vst [vmem:[#allocation12_spill] sm:$0xff] %v1777_v23 }
 0x119   :  { %v687_v30 = vadd.f32 %v1648_v48, %v686_v25 }
 0x11b   :  { %v688_v33 = vadd.f32 %v687_v30, %v1669_v61 }
 0x11d   :  { %v689_v46 = vadd.f32 %v688_v33, %v1685_v7  ;;  %v1781_v33 = vpop.f32.mrf.mxu1 }
 0x11e   :  { %1982 = vst [vmem:[#allocation13_spill] sm:$0xff] %v1781_v33 }
 0x11f   :  { %v690_v52 = vadd.f32 %v1661_v56, %v689_v46 }
 0x121   :  { %v691_v0 = vadd.f32 %v1677_v2, %v690_v52  ;;  %v1785_v2 = vpop.f32.mrf.mxu1 }
 0x123   :  { %v692_v8 = vadd.f32 %v691_v0, %v1701_v17 }
 0x125   :  { %v693_v15 = vadd.f32 %v692_v8, %v1717_v27  ;;  %v1789_v27 = vpop.f32.mrf.mxu1 }
 0x126   :  { %1983 = vst [vmem:[#allocation14_spill] sm:$0xff] %v1789_v27 }
 0x127   :  { %v694_v18 = vadd.f32 %v1693_v12, %v693_v15 }
 0x129   :  { %v695_v25 = vadd.f32 %v1709_v22, %v694_v18  ;;  %v1793_v22 = vpop.f32.mrf.mxu1 }
 0x12b   :  { %v696_v30 = vadd.f32 %v695_v25, %v1733_v43 }
 0x12d   :  { %v697_v46 = vadd.f32 %v696_v30, %v1749_v5  ;;  %v1797_v5 = vpop.f32.mrf.mxu1 }
 0x12f   :  { %v698_v52 = vadd.f32 %v1725_v32, %v697_v46 }
 0x131   :  { %v699_v0 = vadd.f32 %v1741_v57, %v698_v52  ;;  %v1801_v57 = vpop.f32.mrf.mxu1 }
 0x133   :  { %v700_v8 = vadd.f32 %v699_v0, %v1757_v20 }
 0x135   :  { %v701_v15 = vadd.f32 %v700_v8, %v1765_v35  ;;  %v1805_v35 = vpop.f32.mrf.mxu1 }
 0x137   :  { %v702_v18 = vadd.f32 %v1753_v13, %v701_v15 }
 0x139   :  { %v703_v25 = vadd.f32 %v1761_v28, %v702_v18  ;;  %v1809_v28 = vpop.f32.mrf.mxu1 }
 0x13b   :  { %v704_v30 = vadd.f32 %v703_v25, %v1773_v10 }
 0x13d   :  { %v705_v46 = vadd.f32 %v704_v30, %v1781_v33  ;;  %v636_v33 = vpop.f32.mrf.mxu1 }
 0x13f   :  { %v706_v52 = vadd.f32 %v1769_v59, %v705_v46 }
 0x141   :  { %v707_v0 = vadd.f32 %v1777_v23, %v706_v52 }
 0x143   :  { %v708_v8 = vadd.f32 %v707_v0, %v1789_v27 }
 0x145   :  { %v709_v15 = vadd.f32 %v708_v8, %v1797_v5 }
 0x147   :  { %v710_v18 = vadd.f32 %v1785_v2, %v709_v15 }
 0x149   :  { %v711_v25 = vadd.f32 %v1793_v22, %v710_v18 }
 0x14b   :  { %v712_v30 = vadd.f32 %v711_v25, %v1805_v35 }
 0x14d   :  { %v713_v46 = vadd.f32 %v712_v30, %v636_v33 }
 0x14f   :  { %v714_v59 = vadd.f32 %v1801_v57, %v713_v46 }
 0x151   :  { %v715_v52 = vadd.f32 %v1809_v28, %v714_v59 }
 0x153   :  { %v716_v23 = vrot.slane %v715_v52, 4 }
 0x155   :  { %v717_v0 = vadd.f32 %v716_v23, %v715_v52 }
 0x157   :  { %v718_v27 = vrot.slane %v717_v0, 2 }
 0x159   :  { %v719_v10 = vadd.f32 %v718_v27, %v717_v0 }
 0x15b   :  { %v720_v13 = vrot.slane %v719_v10, 1 }
 0x15d   :  { %v721_v8 = vadd.f32 %v720_v13, %v719_v10 }
 0x15f   :  { %1244 = vst [vmem:[%s1956_s2] sm:$0x1] %v721_v8  ;;  %v1818_v15 = vmul.f32 0.001953125, %v721_v8 }
 0x161   :  { %v1821_v18 = vsub.f32 %v636_v33, %v1818_v15  ;;  %v983_v25 = vsub.f32 %v1628_v37, %v1818_v15  ;;  %v984_v59 = vsub.f32 %v1632_v39, %v1818_v15  ;;  %v985_v27 = vsub.f32 %v1626_v36, %v1818_v15 }
 0x162   :  { %v986_v10 = vsub.f32 %v1630_v38, %v1818_v15  ;;  %v987_v30 = vsub.f32 %v1641_v44, %v1818_v15  ;;  %v988_v52 = vsub.f32 %v1651_v50, %v1818_v15  ;;  %v989_v39 = vsub.f32 %v1636_v41, %v1818_v15 }
 0x163   :  { %v1047_v23 = vmul.f32 %v983_v25, %v983_v25  ;;  %v1048_v13 = vmul.f32 %v984_v59, %v984_v59  ;;  %v1049_v46 = vmul.f32 %v985_v27, %v985_v27  ;;  %v990_v25 = vsub.f32 %v1646_v47, %v1818_v15 }
 0x164   :  { %v1050_v37 = vmul.f32 %v986_v10, %v986_v10  ;;  %v1051_v8 = vmul.f32 %v987_v30, %v987_v30  ;;  %v1052_v59 = vmul.f32 %v988_v52, %v988_v52  ;;  %v991_v44 = vsub.f32 %v1659_v55, %v1818_v15 }
 0x165   :  { %v1175_v33 = vadd.f32 %v1048_v13, %v1047_v23  ;;  %v1053_v27 = vmul.f32 %v989_v39, %v989_v39  ;;  %v992_v50 = vsub.f32 %v1667_v60, %v1818_v15  ;;  %v1054_v13 = vmul.f32 %v990_v25, %v990_v25 }
 0x166   :  { %v993_v41 = vsub.f32 %v1656_v53, %v1818_v15  ;;  %v1055_v30 = vmul.f32 %v991_v44, %v991_v44  ;;  %v994_v47 = vsub.f32 %v1664_v58, %v1818_v15  ;;  %v995_v55 = vsub.f32 %v1675_v1, %v1818_v15 }
 0x167   :  { %v1176_v0 = vadd.f32 %v1175_v33, %v1049_v46  ;;  %v1056_v33 = vmul.f32 %v992_v50, %v992_v50  ;;  %v996_v60 = vsub.f32 %v1683_v6, %v1818_v15  ;;  %v997_v53 = vsub.f32 %v1672_v63, %v1818_v15 }
 0x168   :  { %v1058_v39 = vmul.f32 %v994_v47, %v994_v47  ;;  %v998_v58 = vsub.f32 %v1680_v4, %v1818_v15  ;;  %v999_v1 = vsub.f32 %v1691_v11, %v1818_v15  ;;  %v1000_v6 = vsub.f32 %v1699_v16, %v1818_v15 }
 0x169   :  { %v1177_v36 = vadd.f32 %v1176_v0, %v1050_v37  ;;  %v1057_v37 = vmul.f32 %v993_v41, %v993_v41  ;;  %v1061_v44 = vmul.f32 %v997_v53, %v997_v53  ;;  %v1001_v63 = vsub.f32 %v1688_v9, %v1818_v15 }
 0x16a   :  { %v1002_v4 = vsub.f32 %v1696_v14, %v1818_v15  ;;  %v1064_v41 = vmul.f32 %v1000_v6, %v1000_v6  ;;  %v1003_v11 = vsub.f32 %v1707_v21, %v1818_v15  ;;  %v1004_v16 = vsub.f32 %v1715_v26, %v1818_v15 }
 0x16b   :  { %v1178_v38 = vadd.f32 %v1177_v36, %v1051_v8  ;;  %v1059_v36 = vmul.f32 %v995_v55, %v995_v55  ;;  %v1005_v9 = vsub.f32 %v1704_v19, %v1818_v15  ;;  %v1006_v14 = vsub.f32 %v1712_v24, %v1818_v15 }
 0x16c   :  { %v1067_v55 = vmul.f32 %v1003_v11, %v1003_v11  ;;  %v1007_v21 = vsub.f32 %v1723_v31, %v1818_v15  ;;  %v1008_v26 = vsub.f32 %v1731_v40, %v1818_v15  ;;  %v1009_v19 = vsub.f32 %v1720_v29, %v1818_v15 }
 0x16d   :  { %v1179_v23 = vadd.f32 %v1178_v38, %v1052_v59  ;;  %v1060_v59 = vmul.f32 %v996_v60, %v996_v60  ;;  %v1070_v53 = vmul.f32 %v1006_v14, %v1006_v14  ;;  %v1010_v24 = vsub.f32 %v1728_v34, %v1818_v15 }
 0x16e   :  { %v1011_v31 = vsub.f32 %v1739_v54, %v1818_v15  ;;  %v1012_v40 = vsub.f32 %v1747_v3, %v1818_v15  ;;  %v1013_v29 = vsub.f32 %v1736_v49, %v1818_v15  ;;  %v1014_v34 = vsub.f32 %v1744_v62, %v1818_v15 }
 0x16f   :  { %v1180_v10 = vadd.f32 %v1179_v23, %v1053_v27  ;;  %v1062_v23 = vmul.f32 %v998_v58, %v998_v58  ;;  %v1015_v54 = vsub.f32 %v1643_v45, %v1818_v15  ;;  %v1016_v3 = vsub.f32 %v1653_v51, %v1818_v15 }
 0x170   :  { %v1017_v49 = vsub.f32 %v1638_v42, %v1818_v15  ;;  %v1018_v62 = vsub.f32 %v1648_v48, %v1818_v15  ;;  %v1019_v45 = vsub.f32 %v1669_v61, %v1818_v15  ;;  %v1020_v51 = vsub.f32 %v1685_v7, %v1818_v15 }
 0x171   :  { %v1181_v46 = vadd.f32 %v1180_v10, %v1054_v13  ;;  %v1063_v13 = vmul.f32 %v999_v1, %v999_v1  ;;  %v1073_v1 = vmul.f32 %v1009_v19, %v1009_v19  ;;  %v1079_v11 = vmul.f32 %v1015_v54, %v1015_v54 }
 0x172   :  { %v1021_v42 = vsub.f32 %v1661_v56, %v1818_v15  ;;  %v1023_v61 = vsub.f32 %v1701_v17, %v1818_v15  ;;  %v1025_v56 = vsub.f32 %v1693_v12, %v1818_v15  ;;  %v1027_v17 = vsub.f32 %v1733_v43, %v1818_v15 }
 0x173   :  { %v1182_v52 = vadd.f32 %v1181_v46, %v1055_v30  ;;  %v1065_v46 = vmul.f32 %v1001_v63, %v1001_v63  ;;  %v1076_v63 = vmul.f32 %v1012_v40, %v1012_v40  ;;  %v1029_v12 = vsub.f32 %v1725_v32, %v1818_v15 }
 0x174   :  { %v1087_v19 = vmul.f32 %v1023_v61, %v1023_v61  ;;  %v1031_v43 = vsub.f32 %v1757_v20, %v1818_v15 }
 0x175   :  { %v1183_v0 = vadd.f32 %v1182_v52, %v1056_v33  ;;  %v1066_v33 = vmul.f32 %v1002_v4, %v1002_v4  ;;  %v1093_v54 = vmul.f32 %v1029_v12, %v1029_v12 }
 0x177   :  { %v1184_v8 = vadd.f32 %v1183_v0, %v1057_v37  ;;  %v1068_v0 = vmul.f32 %v1004_v16, %v1004_v16 }
 0x179   :  { %v1185_v25 = vadd.f32 %v1184_v8, %v1058_v39  ;;  %v1069_v39 = vmul.f32 %v1005_v9, %v1005_v9  ;;  %v1082_v9 = vmul.f32 %v1018_v62, %v1018_v62  ;;  %v1991_v62 = vld [vmem:[#allocation8_spill] sm:$0xff] }
 0x17b   :  { %v1186_v38 = vadd.f32 %v1185_v25, %v1059_v36  ;;  %v1071_v25 = vmul.f32 %v1007_v21, %v1007_v21 }
 0x17d   :  { %v1187_v27 = vadd.f32 %v1186_v38, %v1060_v59  ;;  %v1072_v59 = vmul.f32 %v1008_v26, %v1008_v26  ;;  %v1985_v26 = vld [vmem:[#allocation4_spill] sm:$0xff] }
 0x17e   :  { %v1024_v7 = vsub.f32 %v1985_v26, %v1818_v15  ;;  %v1996_v26 = vld [vmem:[#allocation14_spill] sm:$0xff] }
 0x17f   :  { %v1188_v50 = vadd.f32 %v1187_v27, %v1061_v44  ;;  %v1074_v27 = vmul.f32 %v1010_v24, %v1010_v24 }
 0x181   :  { %v1189_v10 = vadd.f32 %v1188_v50, %v1062_v23  ;;  %v1075_v23 = vmul.f32 %v1011_v31, %v1011_v31  ;;  %v1089_v31 = vmul.f32 %v1025_v56, %v1025_v56  ;;  %v1040_v56 = vsub.f32 %v1797_v5, %v1818_v15 }
 0x182   :  { %v1045_v5 = vsub.f32 %v1801_v57, %v1818_v15 }
 0x183   :  { %v1190_v30 = vadd.f32 %v1189_v10, %v1063_v13  ;;  %v1077_v10 = vmul.f32 %v1013_v29, %v1013_v29  ;;  %v1091_v29 = vmul.f32 %v1027_v17, %v1027_v17  ;;  %v1104_v17 = vmul.f32 %v1040_v56, %v1040_v56 }
 0x185   :  { %v1191_v47 = vadd.f32 %v1190_v30, %v1064_v41  ;;  %v1078_v41 = vmul.f32 %v1014_v34, %v1014_v34 }
 0x187   :  { %v1192_v52 = vadd.f32 %v1191_v47, %v1065_v46  ;;  %v1080_v47 = vmul.f32 %v1016_v3, %v1016_v3 }
 0x189   :  { %v1193_v37 = vadd.f32 %v1192_v52, %v1066_v33  ;;  %v1081_v33 = vmul.f32 %v1017_v49, %v1017_v49  ;;  %v1990_v49 = vld [vmem:[#allocation7_spill] sm:$0xff] }
 0x18a   :  { %v1033_v32 = vsub.f32 %v1990_v49, %v1818_v15 }
 0x18b   :  { %v1194_v60 = vadd.f32 %v1193_v37, %v1067_v55  ;;  %v1083_v37 = vmul.f32 %v1019_v45, %v1019_v45 }
 0x18d   :  { %v1195_v8 = vadd.f32 %v1194_v60, %v1068_v0  ;;  %v1984_v0 = vld [vmem:[#allocation2_spill] sm:$0xff]  ;;  %v1084_v60 = vmul.f32 %v1020_v51, %v1020_v51 }
 0x18e   :  { %v1022_v48 = vsub.f32 %v1984_v0, %v1818_v15 }
 0x18f   :  { %v1196_v36 = vadd.f32 %v1195_v8, %v1069_v39  ;;  %v1085_v39 = vmul.f32 %v1021_v42, %v1021_v42 }
 0x191   :  { %v1197_v58 = vadd.f32 %v1196_v36, %v1070_v53  ;;  %v1086_v53 = vmul.f32 %v1022_v48, %v1022_v48 }
 0x193   :  { %v1198_v38 = vadd.f32 %v1197_v58, %v1071_v25  ;;  %v1986_v58 = vld [vmem:[#allocation3_spill] sm:$0xff] }
 0x194   :  { %v1026_v24 = vsub.f32 %v1986_v58, %v1818_v15  ;;  %v1041_v58 = vsub.f32 %v1785_v2, %v1818_v15  ;;  %v1046_v2 = vsub.f32 %v1809_v28, %v1818_v15 }
 0x195   :  { %v1199_v44 = vadd.f32 %v1198_v38, %v1072_v59  ;;  %v1088_v59 = vmul.f32 %v1024_v7, %v1024_v7  ;;  %v1039_v7 = vsub.f32 %v1996_v26, %v1818_v15 }
 0x197   :  { %v1200_v6 = vadd.f32 %v1199_v44, %v1073_v1  ;;  %v1987_v44 = vld [vmem:[#allocation6_spill] sm:$0xff] }
 0x198   :  { %v1028_v40 = vsub.f32 %v1987_v44, %v1818_v15  ;;  %v1105_v44 = vmul.f32 %v1041_v58, %v1041_v58 }
 0x199   :  { %v1201_v50 = vadd.f32 %v1200_v6, %v1074_v27  ;;  %v1090_v27 = vmul.f32 %v1026_v24, %v1026_v24  ;;  %v1103_v24 = vmul.f32 %v1039_v7, %v1039_v7 }
 0x19b   :  { %v1202_v13 = vadd.f32 %v1201_v50, %v1075_v23  ;;  %v1988_v50 = vld [vmem:[#allocation5_spill] sm:$0xff] }
 0x19c   :  { %v1030_v34 = vsub.f32 %v1988_v50, %v1818_v15  ;;  %v1109_v50 = vmul.f32 %v1045_v5, %v1045_v5 }
 0x19d   :  { %v1203_v4 = vadd.f32 %v1202_v13, %v1076_v63  ;;  %v1092_v63 = vmul.f32 %v1028_v40, %v1028_v40 }
 0x19f   :  { %v1204_v30 = vadd.f32 %v1203_v4, %v1077_v10  ;;  %v1989_v4 = vld [vmem:[#allocation9_spill] sm:$0xff] }
 0x1a0   :  { %v1032_v3 = vsub.f32 %v1989_v4, %v1818_v15 }
 0x1a1   :  { %v1205_v46 = vadd.f32 %v1204_v30, %v1078_v41  ;;  %v1094_v41 = vmul.f32 %v1030_v34, %v1030_v34 }
 0x1a3   :  { %v1206_v16 = vadd.f32 %v1205_v46, %v1079_v11  ;;  %v1095_v11 = vmul.f32 %v1031_v43, %v1031_v43 }
 0x1a5   :  { %v1207_v52 = vadd.f32 %v1206_v16, %v1080_v47  ;;  %v1034_v47 = vsub.f32 %v1991_v62, %v1818_v15  ;;  %v1096_v16 = vmul.f32 %v1032_v3, %v1032_v3 }
 0x1a7   :  { %v1208_v55 = vadd.f32 %v1207_v52, %v1081_v33  ;;  %v1992_v33 = vld [vmem:[#allocation11_spill] sm:$0xff]  ;;  %v1097_v52 = vmul.f32 %v1033_v32, %v1033_v32  ;;  %v1098_v42 = vmul.f32 %v1034_v47, %v1034_v47 }
 0x1a8   :  { %v1035_v20 = vsub.f32 %v1992_v33, %v1818_v15 }
 0x1a9   :  { %v1209_v14 = vadd.f32 %v1208_v55, %v1082_v9  ;;  %v1993_v9 = vld [vmem:[#allocation13_spill] sm:$0xff] }
 0x1aa   :  { %v1036_v55 = vsub.f32 %v1993_v9, %v1818_v15  ;;  %v1099_v48 = vmul.f32 %v1035_v20, %v1035_v20 }
 0x1ab   :  { %v1210_v21 = vadd.f32 %v1209_v14, %v1083_v37  ;;  %v1994_v14 = vld [vmem:[#allocation10_spill] sm:$0xff] }
 0x1ac   :  { %v1037_v0 = vsub.f32 %v1994_v14, %v1818_v15 }
 0x1ad   :  { %v1211_v8 = vadd.f32 %v1210_v21, %v1084_v60  ;;  %v1995_v21 = vld [vmem:[#allocation12_spill] sm:$0xff] }
 0x1ae   :  { %v1038_v61 = vsub.f32 %v1995_v21, %v1818_v15 }
 0x1af   :  { %v1212_v36 = vadd.f32 %v1211_v8, %v1085_v39  ;;  %v1100_v39 = vmul.f32 %v1036_v55, %v1036_v55 }
 0x1b1   :  { %v1213_v25 = vadd.f32 %v1212_v36, %v1086_v53  ;;  %v1101_v53 = vmul.f32 %v1037_v0, %v1037_v0 }
 0x1b3   :  { %v1214_v38 = vadd.f32 %v1213_v25, %v1087_v19  ;;  %v1102_v19 = vmul.f32 %v1038_v61, %v1038_v61 }
 0x1b5   :  { %v1215_v1 = vadd.f32 %v1214_v38, %v1088_v59  ;;  %v1042_v38 = vsub.f32 %v1793_v22, %v1818_v15  ;;  %v1108_v22 = vmul.f32 %v1821_v18, %v1821_v18 }
 0x1b7   :  { %v1216_v6 = vadd.f32 %v1215_v1, %v1089_v31  ;;  %v1043_v1 = vsub.f32 %v1805_v35, %v1818_v15 }
 0x1b9   :  { %v1217_v23 = vadd.f32 %v1216_v6, %v1090_v27  ;;  %v1106_v27 = vmul.f32 %v1042_v38, %v1042_v38  ;;  %v1107_v12 = vmul.f32 %v1043_v1, %v1043_v1 }
 0x1bb   :  { %v1218_v13 = vadd.f32 %v1217_v23, %v1091_v29 }
 0x1bd   :  { %v1219_v10 = vadd.f32 %v1218_v13, %v1092_v63  ;;  %v1110_v63 = vmul.f32 %v1046_v2, %v1046_v2 }
 0x1bf   :  { %v1220_v30 = vadd.f32 %v1219_v10, %v1093_v54 }
 0x1c1   :  { %v1221_v46 = vadd.f32 %v1220_v30, %v1094_v41 }
 0x1c3   :  { %v1222_v45 = vadd.f32 %v1221_v46, %v1095_v11 }
 0x1c5   :  { %v1223_v51 = vadd.f32 %v1222_v45, %v1096_v16 }
 0x1c7   :  { %v1224_v37 = vadd.f32 %v1223_v51, %v1097_v52 }
 0x1c9   :  { %v1225_v60 = vadd.f32 %v1224_v37, %v1098_v42 }
 0x1cb   :  { %v1226_v8 = vadd.f32 %v1225_v60, %v1099_v48 }
 0x1cd   :  { %v1227_v36 = vadd.f32 %v1226_v8, %v1100_v39 }
 0x1cf   :  { %v1228_v25 = vadd.f32 %v1227_v36, %v1101_v53 }
 0x1d1   :  { %v1229_v59 = vadd.f32 %v1228_v25, %v1102_v19 }
 0x1d3   :  { %v1230_v31 = vadd.f32 %v1229_v59, %v1103_v24 }
 0x1d5   :  { %v1231_v40 = vadd.f32 %v1230_v31, %v1104_v17 }
 0x1d7   :  { %v1232_v6 = vadd.f32 %v1231_v40, %v1105_v44 }
 0x1d9   :  { %v1233_v29 = vadd.f32 %v1232_v6, %v1106_v27 }
 0x1db   :  { %v1234_v23 = vadd.f32 %v1233_v29, %v1107_v12 }
 0x1dd   :  { %v1235_v34 = vadd.f32 %v1234_v23, %v1108_v22 }
 0x1df   :  { %v1236_v35 = vadd.f32 %v1235_v34, %v1109_v50 }
 0x1e1   :  { %v1237_v13 = vadd.f32 %v1236_v35, %v1110_v63 }
 0x1e3   :  { %v1238_v43 = vrot.slane %v1237_v13, 4 }
 0x1e5   :  { %v1239_v54 = vadd.f32 %v1238_v43, %v1237_v13 }
 0x1e7   :  { %v1240_v10 = vrot.slane %v1239_v54, 2 }
 0x1e9   :  { %v1241_v4 = vadd.f32 %v1240_v10, %v1239_v54 }
 0x1eb   :  { %v1242_v3 = vrot.slane %v1241_v4, 1 }
 0x1ed   :  { %v1243_v57 = vadd.f32 %v1242_v3, %v1241_v4 }
 0x1ef   :  { %1245 = vst [vmem:[%s1957_s3] sm:$0x1] %v1243_v57 }

</bundles_post_ra>
